<compile_context>
chip_gen: v7x
topology: tpu7x:2x2x1
jax: 0.10.0
libtpu: 0.0.40
codegen_flags: <defaults>
</compile_context>

<pallas_src>
import math
from functools import partial

import jax
import jax.numpy as jnp
from jax import lax
from jax.experimental import pallas as pl
from jax.experimental.pallas import tpu as pltpu

GN_EPS = 1e-5
GAMMA = 1.0  # macow-style residual scale (1.0 == plain `out + x`)


def _attn_gn_kernel(x_ref, w_ref, p_ref, o_ref, *,
                    C, heads, dim, eps, gamma, mxu_dtype, approx_recip):
    # x_ref : (1, C, T)    one batch element, channel-major (T = H*W on the lane axis)
    # w_ref : (R, C)       fused projection weight, R = 2C (q,k) + heads*(dim+1) (v rows + ones row per head)
    # p_ref : (R+2C, 1)    [fused bias (R) | gn_weight (C) | gn_bias (C)] packed as one column
    # o_ref : (1, C, T)
    T = x_ref.shape[2]
    R = 2 * C + heads * (dim + 1)

    x32 = x_ref[0].astype(jnp.float32)                           # (C, T), kept f32 for the residual
    prm = p_ref[...].astype(jnp.float32)                         # (R+2C, 1)
    bias = prm[0:R, :]                                           # (R, 1)

    # Fused QKV(+ones) projection for ALL heads: (R, C) @ (C, T) -> (R, T), f32 accumulation.
    qkv = jnp.dot(w_ref[...].astype(mxu_dtype), x32.astype(mxu_dtype),
                  preferred_element_type=jnp.float32) + bias

    # Transpose the whole q block once (C, T) -> (T, C); per-head q is then a static column slice.
    qT = qkv[0:C, :].T.astype(mxu_dtype)                         # (T, C)
    inv_n = 1.0 / (dim * T)

    for h in range(heads):                                       # heads is small & static -> unrolled at trace time
        lo, hi = h * dim, (h + 1) * dim
        q_h = qT[:, lo:hi]                                       # (T, dim)   (scale already folded into weights)
        k_h = qkv[C + lo:C + hi, :].astype(mxu_dtype)            # (dim, T)
        v_lo = 2 * C + h * (dim + 1)
        v_aug = qkv[v_lo:v_lo + dim + 1, :].astype(mxu_dtype)    # (dim+1, T): v rows + constant-ones row

        # scores over spatial positions
        s = jnp.dot(q_h, k_h, preferred_element_type=jnp.float32)          # (T, T)
        m = jnp.max(s, axis=-1, keepdims=True)
        p = jnp.exp(s - m)                                                  # unnormalized probs, f32

        # PV matmul; the ones row of v_aug yields the softmax denominator already in (1, T) orientation
        pv = lax.dot_general(v_aug, p.astype(mxu_dtype),
                             (((1,), (1,)), ((), ())),
                             preferred_element_type=jnp.float32)            # (dim+1, T)
        inv_l = pl.reciprocal(pv[dim:dim + 1, :], approx=approx_recip)      # (1, T)
        attn = pv[0:dim, :] * inv_l                                         # (dim, T)

        # residual + GroupNorm (one group == this head's channels; stats over dim*T elements)
        y = gamma * attn + x32[lo:hi, :]                                    # (dim, T)
        mu = jnp.sum(jnp.sum(y, axis=1, keepdims=True), axis=0, keepdims=True) * inv_n
        d = y - mu
        var = jnp.sum(jnp.sum(d * d, axis=1, keepdims=True), axis=0, keepdims=True) * inv_n
        yn = d * lax.rsqrt(var + eps)
        gw = prm[R + lo:R + hi, :]                                          # (dim, 1) per-channel affine
        gb = prm[R + C + lo:R + C + hi, :]
        o_ref[0, lo:hi, :] = (yn * gw + gb).astype(o_ref.dtype)             # lane-dense (T-wide) store


def self_attn_layer(x_nchw, params, heads, pos_enc=None, eps=GN_EPS,
                    mxu_dtype=jnp.bfloat16):
    """Forward of SelfAttnLayer. x_nchw: (B, C, H, W)."""
    if pos_enc is not None:
        x_nchw = x_nchw + pos_enc
    B, C, H, W = x_nchw.shape
    assert C % heads == 0
    dim = C // heads
    T = H * W
    R = 2 * C + heads * (dim + 1)

    # free reshape only (no host transposes): channel-major, T on the lane axis
    x_ct = x_nchw.reshape(B, C, T)

    W3 = params["proj_w"].astype(jnp.float32)     # (3C, C) effective 1x1-conv (weight-norm folded in)
    b3 = params["proj_b"].astype(jnp.float32)     # (3C,)
    scale = 1.0 / math.sqrt(dim)

    # fused projection rows: [ q (C rows, pre-scaled) | k (C rows) | per head: v (dim rows) + ones row ]
    w_rows = [W3[0:C] * scale, W3[C:2 * C]]
    b_rows = [b3[0:C] * scale, b3[C:2 * C]]
    for h in range(heads):
        lo, hi = h * dim, (h + 1) * dim
        w_rows.append(W3[2 * C + lo:2 * C + hi])
        w_rows.append(jnp.zeros((1, C), jnp.float32))      # zero-weight / bias-1 row -> constant ones row
        b_rows.append(b3[2 * C + lo:2 * C + hi])
        b_rows.append(jnp.ones((1,), jnp.float32))
    w_fused = jnp.concatenate(w_rows, axis=0).astype(mxu_dtype)                       # (R, C)
    packed = jnp.concatenate(b_rows + [params["gn_w"].astype(jnp.float32),
                                       params["gn_b"].astype(jnp.float32)])
    packed = packed.reshape(R + 2 * C, 1)                                             # (R+2C, 1), f32

    approx_recip = (mxu_dtype != jnp.float32)

    out = pl.pallas_call(
        partial(_attn_gn_kernel, C=C, heads=heads, dim=dim, eps=eps,
                gamma=GAMMA, mxu_dtype=mxu_dtype, approx_recip=approx_recip),
        out_shape=jax.ShapeDtypeStruct((B, C, T), x_nchw.dtype),
        grid_spec=pltpu.PrefetchScalarGridSpec(
            num_scalar_prefetch=0,
            grid=(B,),
            in_specs=[
                pl.BlockSpec((1, C, T), lambda b: (b, 0, 0)),      # x (channel-major)
                pl.BlockSpec((R, C), lambda b: (0, 0)),            # fused projection weight
                pl.BlockSpec((R + 2 * C, 1), lambda b: (0, 0)),    # packed bias + GN affine (single DMA)
            ],
            out_specs=pl.BlockSpec((1, C, T), lambda b: (b, 0, 0)),
        ),
        compiler_params=pltpu.CompilerParams(
            dimension_semantics=("parallel",),                     # batch axis: megacore / both v7x TCs
            vmem_limit_bytes=64 * 1024 * 1024),
    )(x_ct, w_fused, packed)

    return out.reshape(B, C, H, W)


def _reference(x, W3, b3, gn_w, gn_b, heads, eps=GN_EPS):
    """Pure-JAX reference of the same forward (for verification)."""
    B, C, H, Wd = x.shape
    dim = C // heads
    T = H * Wd
    hp = lax.Precision.HIGHEST
    c = jnp.einsum('oc,bchw->bohw', W3, x, precision=hp) + b3[None, :, None, None]   # 1x1 conv
    c = c.reshape(B, 3, heads, dim, T)
    q, k, v = c[:, 0], c[:, 1], c[:, 2]                                              # (B, heads, dim, T)
    s = jnp.einsum('bhdi,bhdj->bhij', q, k, precision=hp) / math.sqrt(dim)
    p = jax.nn.softmax(s, axis=-1)
    out = jnp.einsum('bhij,bhdj->bhdi', p, v, precision=hp).reshape(B, C, H, Wd)
    out = GAMMA * out + x
    g = out.reshape(B, heads, dim * T)
    mu = g.mean(-1, keepdims=True)
    var = ((g - mu) ** 2).mean(-1, keepdims=True)
    g = ((g - mu) / jnp.sqrt(var + eps)).reshape(B, C, H, Wd)
    return g * gn_w[None, :, None, None] + gn_b[None, :, None, None]


if __name__ == "__main__":
    B, C, H, W = 2, 8, 16, 16      # T = H*W = 256 -> lane-aligned stores / scores tiles
    heads = 2

    key = jax.random.PRNGKey(0)
    kx, kw, kb, kgw, kgb = jax.random.split(key, 5)
    x = jax.random.normal(kx, (B, C, H, W), jnp.float32)
    # deterministic synthetic parameters (shapes per MultiHeadAttention2d / GroupNorm __init__)
    proj_w = jax.random.normal(kw, (3 * C, C), jnp.float32) * (1.0 / math.sqrt(C))   # 1x1 conv weight
    proj_b = jax.random.normal(kb, (3 * C,), jnp.float32) * 0.1
    gn_w = 1.0 + 0.1 * jax.random.normal(kgw, (C,), jnp.float32)
    gn_b = 0.1 * jax.random.normal(kgb, (C,), jnp.float32)
    params = dict(proj_w=proj_w, proj_b=proj_b, gn_w=gn_w, gn_b=gn_b)

    y_ref = _reference(x, proj_w, proj_b, gn_w, gn_b, heads)

    # exact path: f32 MXU feeds -> tight check vs pure-JAX reference
    y32 = jax.block_until_ready(self_attn_layer(x, params, heads, mxu_dtype=jnp.float32))
    assert y32.shape == (B, C, H, W)
    assert jnp.allclose(y32, y_ref, atol=1e-4, rtol=1e-4), "f32 kernel mismatch vs reference"

    # fast path: bf16 MXU feeds (production setting for v5e/v6e/v7x); softmax/GroupNorm stay f32.
    # Loose sanity bound only -- bf16 inputs legitimately perturb the output at the ~1e-2 level.
    ybf = jax.block_until_ready(self_attn_layer(x, params, heads, mxu_dtype=jnp.bfloat16))
    assert bool(jnp.all(jnp.isfinite(ybf)))
    bf_err = float(jnp.max(jnp.abs(ybf - y_ref)))
    assert bf_err < 0.25, f"bf16 fast path diverged from reference (max abs err {bf_err})"

    print("KERNEL_OK")
</pallas_src>

<mosaic_0001>
module attributes {stable_mosaic.version = 11 : i64} {
  func.func @_attn_gn_kernel(%arg0: i32, %arg1: memref<1x8x256xf32, #tpu.memory_space<vmem>>, %arg2: memref<26x8xf32, #tpu.memory_space<vmem>>, %arg3: memref<42x1xf32, #tpu.memory_space<vmem>>, %arg4: memref<1x8x256xf32, #tpu.memory_space<vmem>>) attributes {dimension_semantics = [#tpu.dimension_semantics<parallel>], iteration_bounds = array<i64: 2>, scalar_prefetch = 0 : i64, scratch_operands = 0 : i64, tpu.core_type = #tpu.core_type<tc>, window_params = [{transform_indices = @transform_0, window_bounds = array<i64: 1, 8, 256>}, {pipeline_mode = #tpu.pipeline_mode<synchronous>, transform_indices = @transform_1, window_bounds = array<i64: 26, 8>}, {pipeline_mode = #tpu.pipeline_mode<synchronous>, transform_indices = @transform_2, window_bounds = array<i64: 42, 1>}, {transform_indices = @transform_3, window_bounds = array<i64: 1, 8, 256>}]} {
    %c0 = arith.constant 0 : index
    %c0_0 = arith.constant 0 : index
    %c0_1 = arith.constant 0 : index
    %0 = vector.load %arg1[%c0, %c0_0, %c0_1] : memref<1x8x256xf32, #tpu.memory_space<vmem>>, vector<1x8x256xf32>
    %1 = vector.shape_cast %0 : vector<1x8x256xf32> to vector<8x256xf32>
    %c0_2 = arith.constant 0 : index
    %c0_3 = arith.constant 0 : index
    %2 = vector.load %arg3[%c0_2, %c0_3] : memref<42x1xf32, #tpu.memory_space<vmem>>, vector<42x1xf32>
    %3 = vector.extract_strided_slice %2 {offsets = [0, 0], sizes = [26, 1], strides = [1, 1]} : vector<42x1xf32> to vector<26x1xf32>
    %c0_4 = arith.constant 0 : index
    %c0_5 = arith.constant 0 : index
    %4 = vector.load %arg2[%c0_4, %c0_5] : memref<26x8xf32, #tpu.memory_space<vmem>>, vector<26x8xf32>
    %cst = arith.constant dense<0.000000e+00> : vector<26x256xf32>
    %5 = tpu.matmul %4, %1, %cst {dimension_numbers = #tpu.dot_dimension_numbers<[1], [0], [0], [1], [0, 0, 1, 1], [], []>} : vector<26x8xf32>, vector<8x256xf32>, vector<26x256xf32> -> vector<26x256xf32>
    %6 = vector.broadcast %3 : vector<26x1xf32> to vector<26x256xf32>
    %7 = arith.addf %5, %6 : vector<26x256xf32>
    %8 = vector.extract_strided_slice %7 {offsets = [0, 0], sizes = [8, 256], strides = [1, 1]} : vector<26x256xf32> to vector<8x256xf32>
    %9 = tpu.transpose %8, [1, 0] : vector<8x256xf32> -> vector<256x8xf32>
    %10 = vector.extract_strided_slice %9 {offsets = [0, 0], sizes = [256, 4], strides = [1, 1]} : vector<256x8xf32> to vector<256x4xf32>
    %11 = vector.extract_strided_slice %7 {offsets = [8, 0], sizes = [4, 256], strides = [1, 1]} : vector<26x256xf32> to vector<4x256xf32>
    %12 = vector.extract_strided_slice %7 {offsets = [16, 0], sizes = [5, 256], strides = [1, 1]} : vector<26x256xf32> to vector<5x256xf32>
    %cst_6 = arith.constant dense<0.000000e+00> : vector<256x256xf32>
    %13 = tpu.matmul %10, %11, %cst_6 {dimension_numbers = #tpu.dot_dimension_numbers<[1], [0], [0], [1], [0, 0, 1, 1], [], []>} : vector<256x4xf32>, vector<4x256xf32>, vector<256x256xf32> -> vector<256x256xf32>
    %cst_7 = arith.constant dense<0xFF800000> : vector<256xf32>
    %14 = vector.multi_reduction <maximumf>, %13, %cst_7 [1] : vector<256x256xf32> to vector<256xf32>
    %15 = vector.shape_cast %14 : vector<256xf32> to vector<256x1xf32>
    %16 = vector.broadcast %15 : vector<256x1xf32> to vector<256x256xf32>
    %17 = arith.subf %13, %16 : vector<256x256xf32>
    %18 = math.exp %17 : vector<256x256xf32>
    %cst_8 = arith.constant dense<0.000000e+00> : vector<5x256xf32>
    %19 = tpu.matmul %12, %18, %cst_8 {dimension_numbers = #tpu.dot_dimension_numbers<[1], [1], [0], [0], [0, 0, 1, 0], [], []>} : vector<5x256xf32>, vector<256x256xf32>, vector<5x256xf32> -> vector<5x256xf32>
    %20 = vector.extract_strided_slice %19 {offsets = [4, 0], sizes = [1, 256], strides = [1, 1]} : vector<5x256xf32> to vector<1x256xf32>
    %21 = tpu.reciprocal %20 : vector<1x256xf32> -> vector<1x256xf32>
    %22 = vector.extract_strided_slice %19 {offsets = [0, 0], sizes = [4, 256], strides = [1, 1]} : vector<5x256xf32> to vector<4x256xf32>
    %23 = vector.broadcast %21 : vector<1x256xf32> to vector<4x256xf32>
    %24 = arith.mulf %22, %23 : vector<4x256xf32>
    %cst_9 = arith.constant 1.000000e+00 : f32
    %25 = vector.broadcast %cst_9 : f32 to vector<4x256xf32>
    %26 = arith.mulf %25, %24 : vector<4x256xf32>
    %27 = vector.extract_strided_slice %1 {offsets = [0, 0], sizes = [4, 256], strides = [1, 1]} : vector<8x256xf32> to vector<4x256xf32>
    %28 = arith.addf %26, %27 : vector<4x256xf32>
    %cst_10 = arith.constant dense<0.000000e+00> : vector<4xf32>
    %29 = vector.multi_reduction <add>, %28, %cst_10 [1] : vector<4x256xf32> to vector<4xf32>
    %30 = vector.shape_cast %29 : vector<4xf32> to vector<4x1xf32>
    %cst_11 = arith.constant dense<0.000000e+00> : vector<1xf32>
    %31 = vector.multi_reduction <add>, %30, %cst_11 [0] : vector<4x1xf32> to vector<1xf32>
    %32 = vector.shape_cast %31 : vector<1xf32> to vector<1x1xf32>
    %cst_12 = arith.constant 9.765625E-4 : f32
    %33 = vector.broadcast %cst_12 : f32 to vector<1x1xf32>
    %34 = arith.mulf %32, %33 : vector<1x1xf32>
    %35 = vector.broadcast %34 : vector<1x1xf32> to vector<4x256xf32>
    %36 = arith.subf %28, %35 : vector<4x256xf32>
    %37 = arith.mulf %36, %36 : vector<4x256xf32>
    %cst_13 = arith.constant dense<0.000000e+00> : vector<4xf32>
    %38 = vector.multi_reduction <add>, %37, %cst_13 [1] : vector<4x256xf32> to vector<4xf32>
    %39 = vector.shape_cast %38 : vector<4xf32> to vector<4x1xf32>
    %cst_14 = arith.constant dense<0.000000e+00> : vector<1xf32>
    %40 = vector.multi_reduction <add>, %39, %cst_14 [0] : vector<4x1xf32> to vector<1xf32>
    %41 = vector.shape_cast %40 : vector<1xf32> to vector<1x1xf32>
    %cst_15 = arith.constant 9.765625E-4 : f32
    %42 = vector.broadcast %cst_15 : f32 to vector<1x1xf32>
    %43 = arith.mulf %41, %42 : vector<1x1xf32>
    %cst_16 = arith.constant 9.99999974E-6 : f32
    %44 = vector.broadcast %cst_16 : f32 to vector<1x1xf32>
    %45 = arith.addf %43, %44 : vector<1x1xf32>
    %46 = math.rsqrt %45 : vector<1x1xf32>
    %47 = vector.broadcast %46 : vector<1x1xf32> to vector<4x256xf32>
    %48 = arith.mulf %36, %47 : vector<4x256xf32>
    %49 = vector.extract_strided_slice %2 {offsets = [26, 0], sizes = [4, 1], strides = [1, 1]} : vector<42x1xf32> to vector<4x1xf32>
    %50 = vector.extract_strided_slice %2 {offsets = [34, 0], sizes = [4, 1], strides = [1, 1]} : vector<42x1xf32> to vector<4x1xf32>
    %51 = vector.broadcast %49 : vector<4x1xf32> to vector<4x256xf32>
    %52 = arith.mulf %48, %51 : vector<4x256xf32>
    %53 = vector.broadcast %50 : vector<4x1xf32> to vector<4x256xf32>
    %54 = arith.addf %52, %53 : vector<4x256xf32>
    %c0_17 = arith.constant 0 : index
    %c0_18 = arith.constant 0 : index
    %c0_19 = arith.constant 0 : index
    %55 = vector.load %arg4[%c0_17, %c0_18, %c0_19] : memref<1x8x256xf32, #tpu.memory_space<vmem>>, vector<1x4x256xf32>
    %56 = vector.shape_cast %55 : vector<1x4x256xf32> to vector<4x256xf32>
    %57 = vector.shape_cast %54 : vector<4x256xf32> to vector<1x4x256xf32>
    tpu.vector_store %arg4[%c0_17, %c0_18, %c0_19], %57 {strides = array<i32>} : memref<1x8x256xf32, #tpu.memory_space<vmem>>, vector<1x4x256xf32>,
    %58 = vector.extract_strided_slice %9 {offsets = [0, 4], sizes = [256, 4], strides = [1, 1]} : vector<256x8xf32> to vector<256x4xf32>
    %59 = vector.extract_strided_slice %7 {offsets = [12, 0], sizes = [4, 256], strides = [1, 1]} : vector<26x256xf32> to vector<4x256xf32>
    %60 = vector.extract_strided_slice %7 {offsets = [21, 0], sizes = [5, 256], strides = [1, 1]} : vector<26x256xf32> to vector<5x256xf32>
    %cst_20 = arith.constant dense<0.000000e+00> : vector<256x256xf32>
    %61 = tpu.matmul %58, %59, %cst_20 {dimension_numbers = #tpu.dot_dimension_numbers<[1], [0], [0], [1], [0, 0, 1, 1], [], []>} : vector<256x4xf32>, vector<4x256xf32>, vector<256x256xf32> -> vector<256x256xf32>
    %cst_21 = arith.constant dense<0xFF800000> : vector<256xf32>
    %62 = vector.multi_reduction <maximumf>, %61, %cst_21 [1] : vector<256x256xf32> to vector<256xf32>
    %63 = vector.shape_cast %62 : vector<256xf32> to vector<256x1xf32>
    %64 = vector.broadcast %63 : vector<256x1xf32> to vector<256x256xf32>
    %65 = arith.subf %61, %64 : vector<256x256xf32>
    %66 = math.exp %65 : vector<256x256xf32>
    %cst_22 = arith.constant dense<0.000000e+00> : vector<5x256xf32>
    %67 = tpu.matmul %60, %66, %cst_22 {dimension_numbers = #tpu.dot_dimension_numbers<[1], [1], [0], [0], [0, 0, 1, 0], [], []>} : vector<5x256xf32>, vector<256x256xf32>, vector<5x256xf32> -> vector<5x256xf32>
    %68 = vector.extract_strided_slice %67 {offsets = [4, 0], sizes = [1, 256], strides = [1, 1]} : vector<5x256xf32> to vector<1x256xf32>
    %69 = tpu.reciprocal %68 : vector<1x256xf32> -> vector<1x256xf32>
    %70 = vector.extract_strided_slice %67 {offsets = [0, 0], sizes = [4, 256], strides = [1, 1]} : vector<5x256xf32> to vector<4x256xf32>
    %71 = vector.broadcast %69 : vector<1x256xf32> to vector<4x256xf32>
    %72 = arith.mulf %70, %71 : vector<4x256xf32>
    %cst_23 = arith.constant 1.000000e+00 : f32
    %73 = vector.broadcast %cst_23 : f32 to vector<4x256xf32>
    %74 = arith.mulf %73, %72 : vector<4x256xf32>
    %75 = vector.extract_strided_slice %1 {offsets = [4, 0], sizes = [4, 256], strides = [1, 1]} : vector<8x256xf32> to vector<4x256xf32>
    %76 = arith.addf %74, %75 : vector<4x256xf32>
    %cst_24 = arith.constant dense<0.000000e+00> : vector<4xf32>
    %77 = vector.multi_reduction <add>, %76, %cst_24 [1] : vector<4x256xf32> to vector<4xf32>
    %78 = vector.shape_cast %77 : vector<4xf32> to vector<4x1xf32>
    %cst_25 = arith.constant dense<0.000000e+00> : vector<1xf32>
    %79 = vector.multi_reduction <add>, %78, %cst_25 [0] : vector<4x1xf32> to vector<1xf32>
    %80 = vector.shape_cast %79 : vector<1xf32> to vector<1x1xf32>
    %cst_26 = arith.constant 9.765625E-4 : f32
    %81 = vector.broadcast %cst_26 : f32 to vector<1x1xf32>
    %82 = arith.mulf %80, %81 : vector<1x1xf32>
    %83 = vector.broadcast %82 : vector<1x1xf32> to vector<4x256xf32>
    %84 = arith.subf %76, %83 : vector<4x256xf32>
    %85 = arith.mulf %84, %84 : vector<4x256xf32>
    %cst_27 = arith.constant dense<0.000000e+00> : vector<4xf32>
    %86 = vector.multi_reduction <add>, %85, %cst_27 [1] : vector<4x256xf32> to vector<4xf32>
    %87 = vector.shape_cast %86 : vector<4xf32> to vector<4x1xf32>
    %cst_28 = arith.constant dense<0.000000e+00> : vector<1xf32>
    %88 = vector.multi_reduction <add>, %87, %cst_28 [0] : vector<4x1xf32> to vector<1xf32>
    %89 = vector.shape_cast %88 : vector<1xf32> to vector<1x1xf32>
    %cst_29 = arith.constant 9.765625E-4 : f32
    %90 = vector.broadcast %cst_29 : f32 to vector<1x1xf32>
    %91 = arith.mulf %89, %90 : vector<1x1xf32>
    %cst_30 = arith.constant 9.99999974E-6 : f32
    %92 = vector.broadcast %cst_30 : f32 to vector<1x1xf32>
    %93 = arith.addf %91, %92 : vector<1x1xf32>
    %94 = math.rsqrt %93 : vector<1x1xf32>
    %95 = vector.broadcast %94 : vector<1x1xf32> to vector<4x256xf32>
    %96 = arith.mulf %84, %95 : vector<4x256xf32>
    %97 = vector.extract_strided_slice %2 {offsets = [30, 0], sizes = [4, 1], strides = [1, 1]} : vector<42x1xf32> to vector<4x1xf32>
    %98 = vector.extract_strided_slice %2 {offsets = [38, 0], sizes = [4, 1], strides = [1, 1]} : vector<42x1xf32> to vector<4x1xf32>
    %99 = vector.broadcast %97 : vector<4x1xf32> to vector<4x256xf32>
    %100 = arith.mulf %96, %99 : vector<4x256xf32>
    %101 = vector.broadcast %98 : vector<4x1xf32> to vector<4x256xf32>
    %102 = arith.addf %100, %101 : vector<4x256xf32>
    %c0_31 = arith.constant 0 : index
    %c4 = arith.constant 4 : index
    %c0_32 = arith.constant 0 : index
    %103 = vector.load %arg4[%c0_31, %c4, %c0_32] : memref<1x8x256xf32, #tpu.memory_space<vmem>>, vector<1x4x256xf32>
    %104 = vector.shape_cast %103 : vector<1x4x256xf32> to vector<4x256xf32>
    %105 = vector.shape_cast %102 : vector<4x256xf32> to vector<1x4x256xf32>
    tpu.vector_store %arg4[%c0_31, %c4, %c0_32], %105 {strides = array<i32>} : memref<1x8x256xf32, #tpu.memory_space<vmem>>, vector<1x4x256xf32>,
    return
  }
  func.func @transform_0(%arg0: i32) -> (i32, i32, i32) {
    %c0_i32 = arith.constant 0 : i32
    %c0_i32_0 = arith.constant 0 : i32
    %c0_i32_1 = arith.constant 0 : i32
    return %arg0, %c0_i32, %c0_i32_0 : i32, i32, i32
  }
  func.func @transform_1(%arg0: i32) -> (i32, i32) {
    %c0_i32 = arith.constant 0 : i32
    %c0_i32_0 = arith.constant 0 : i32
    %c0_i32_1 = arith.constant 0 : i32
    return %c0_i32, %c0_i32_0 : i32, i32
  }
  func.func @transform_2(%arg0: i32) -> (i32, i32) {
    %c0_i32 = arith.constant 0 : i32
    %c0_i32_0 = arith.constant 0 : i32
    %c0_i32_1 = arith.constant 0 : i32
    return %c0_i32, %c0_i32_0 : i32, i32
  }
  func.func @transform_3(%arg0: i32) -> (i32, i32, i32) {
    %c0_i32 = arith.constant 0 : i32
    %c0_i32_0 = arith.constant 0 : i32
    %c0_i32_1 = arith.constant 0 : i32
    return %arg0, %c0_i32, %c0_i32_0 : i32, i32, i32
  }
}

</mosaic_0001>

<bundles_post_ra>
// kernel: tpu_custom_call.1
= control target key start
LH: loop header
LB: loop body
LE: loop exit
PB: predicated region body
PF: predicated region fallthrough
CT: control target
= control target key end

     0   :  { %8 = vsyncpa [#allocation3], 0  ;;  %s3964_s0 = inlined_call_operand.hbm [shape: f32[2,8,256], index: 0, kind: input, shape index: {}]   ;;  %s3965_s1 = inlined_call_operand.hbm [shape: f32[26,8], index: 1, kind: input, shape index: {}]   ;;  %s3966_s2 = inlined_call_operand.hbm [shape: f32[42,1], index: 2, kind: input, shape index: {}]   ;;  %s3967_s3 = inlined_call_operand.hbm [shape: f32[2,8,256], index: 3, kind: output, shape index: {}]  }
   0x1   :  { %10 = vsyncpa [#allocation3 + $0x1], 0 }
   0x2   :  { %11 = vsyncpa [#allocation6], 0 }
   0x3   :  { %12 = vsyncpa [#allocation4], 0 }
   0x4   :  { %14 = vsyncpa [#allocation4 + $0x1], 0  ;;  %s2892_s12 = smov 0   ;;  %s2894_s13 = smov 0  }
   0x5   :  { %s2896_s14 = smov 0   ;;  %s2898_s15 = smov 0  }
   0x6 LB: > { %s2913_s16 = sadd.s32 4294967295, %s2861_s15   ;;  %s2141_s17 = sadd.s32 4294967294, %s2861_s15   ;;  %s2861_s15 = sphi %s2898_s15, %s4112_s15   ;;  %s2857_s14 = sphi %s2896_s14, %s4111_s14   ;;  %s2853_s13 = sphi %s2894_s13, %s4110_s13   ;;  %s2849_s12 = sphi %s2892_s12, %s4109_s12  }
   0x7   : > { %p40_p0 = scmp.ne.s32.totalorder %s2853_s13, %s2849_s12  ;;  %p3968_p1 = scmp.eq.s32.totalorder %s2913_s16, 0 }
   0x8   : > { %p112_p3 = scmp.eq.s32.totalorder %s2141_s17, 1  ;;  %p2142_p5 = scmp.ge.s32.totalorder %s2861_s15, 1 }
   0x9   : > { %p2922_p4 = por %p3968_p1, %p40_p0  ;;  %p119_p7 = scmp.lt.s32.totalorder %s2861_s15, 3 }
   0xa   : > { %p2927_p6 = por %p112_p3, %p40_p0  ;;  %s2863_s21 = smov [#allocation5]  }
   0xb   : > { %s4011_s18 = scalar_select %p2922_p4, 1, 0 }
   0xc   : > { %s4012_s19 = scalar_select %p2927_p6, 1, 0 }
   0xd   : > { %p2932_p8 = pnand %p2142_p5, %p119_p7  ;;  %s131_s22 = sshll.u32 %s2863_s21, 4  ;;  %s2936_s22 = int_to_ptr.vmem [resolvable:$true] %s131_s22 }
   0xe   : > { %s2864_s24 = smov [#allocation7]   ;;  %s2705_s28 = scalar_lea.hbm %s3965_s1, 512 }
   0xf   : > { %p2373_p9 = pneg %p2932_p8  ;;  %s144_s25 = sshll.u32 %s2864_s24, 4  ;;  %s2947_s25 = int_to_ptr.vmem [resolvable:$true] %s144_s25 }
  0x10   : > { %p2706_p12 = scmp.ne.s32.totalorder %s3965_s1, %s2705_s28  ;;  %p2712_p5 = scmp.lt.u32.totalorder %s2705_s28, %s3965_s1 }
  0x11   : > { %p2943_p11 = pnand %p2373_p9, %p3968_p1 }
  0x13   : > { %p2707_p13 = pneg %p2943_p11 }
  0x15   : > { %p2708_p0 = pnand %p2707_p13, %p2706_p12 }
  0x17   : > { %p2709_p3 = pneg %p2708_p0 }
  0x19   : > { %p2714_p7 = pnand %p2712_p5, %p2709_p3 }
  0x1b   : > { %2717 = shalt.err (!%p2714_p7)
}
  0x1c   : > { %s2718_s6 = scalar_lea.vmem %s2936_s22, 512  ;;  %p2726_p2 = scmp.lt.s32.totalorder %s2936_s22, %s2936_s22 }
  0x1d   : > { %p2719_p9 = scmp.ne.s32.totalorder %s2936_s22, %s2718_s6  ;;  %p2727_p12 = scmp.lt.s32.totalorder %s2718_s6, %s2718_s6 }
  0x1f   : > { %p2721_p10 = pnand %p2719_p9, %p2707_p13  ;;  %p2728_p0 = por %p2727_p12, %p2726_p2 }
  0x21   : > { %p2722_p1 = pneg %p2721_p10 }
  0x23   : > { %p2729_p6 = pnand %p2728_p0, %p2722_p1 }
  0x25   : > { %2732 = shalt.err (!%p2729_p6)
}
  0x26   : > { %s2865_s7 = smov 128   ;;  %s2866_s8 = smov 8  }
  0x27   : > { %2376 = dma.hbm_to_vmem [thread:$0]  (!%p2943_p11), %s3965_s1, 512, %s2936_s22, [#allocation6], %s2865_s7, %s2865_s7, %s2866_s8  }
  0x28   : > { %s2733_s21 = scalar_lea.hbm %s3966_s2, 768 }
  0x29   : > { %p2734_p2 = scmp.ne.s32.totalorder %s3966_s2, %s2733_s21  ;;  %p2740_p10 = scmp.lt.u32.totalorder %s2733_s21, %s3966_s2 }
  0x2b   : > { %p2736_p1 = pnand %p2734_p2, %p2707_p13 }
  0x2d   : > { %p2737_p6 = pneg %p2736_p1 }
  0x2f   : > { %p2742_p3 = pnand %p2740_p10, %p2737_p6 }
  0x31   : > { %2745 = shalt.err (!%p2742_p3)
}
  0x32   : > { %s2746_s22 = scalar_lea.vmem %s2947_s25, 768  ;;  %p2754_p12 = scmp.lt.s32.totalorder %s2947_s25, %s2947_s25 }
  0x33   : > { %p2747_p5 = scmp.ne.s32.totalorder %s2947_s25, %s2746_s22  ;;  %p2755_p0 = scmp.lt.s32.totalorder %s2746_s22, %s2746_s22 }
  0x35   : > { %p2749_p7 = pnand %p2747_p5, %p2707_p13  ;;  %p2756_p2 = por %p2755_p0, %p2754_p12 }
  0x37   : > { %p2750_p9 = pneg %p2749_p7 }
  0x39   : > { %p2757_p1 = pnand %p2756_p2, %p2750_p9 }
  0x3b   : > { %2760 = shalt.err (!%p2757_p1)
}
  0x3c   : > { %2379 = dma.hbm_to_vmem [thread:$0]  (!%p2943_p11), %s3966_s2, 768, %s2947_s25, [#allocation6], %s2865_s7, %s2865_s7, %s2866_s8  }
  0x3d   : > { %s3002_s4 = sadd.s32 1, %s2861_s15   ;;  %s27_s23 = sadd.s32 1, %s2857_s14 }
  0x3e   : > { %s24_s5 = ssub.s32 %s2861_s15, %s3002_s4  ;;  %p34_p13 = scmp.ne.s32.totalorder %s2857_s14, %s2853_s13 }
  0x3f   : > { %p25_p6 = scmp.eq.s32.totalorder %s24_s5, 0  ;;  %p35_p10 = scmp.eq.s32.totalorder %s2861_s15, 0 }
  0x40   : > { %p4015_p3 = scmp.eq.s32.totalorder %s2913_s16, 1  ;;  %p2390_p7 = scmp.lt.s32.totalorder %s2861_s15, 2 }
  0x41   : > { %s3018_s9 = scalar_select %p25_p6, %s2857_s14, %s27_s23  }
  0x42   : > { %p3012_p5 = por %p4015_p3, %p34_p13  ;;  %p36_p9 = por %p35_p10, %p34_p13 }
  0x43   : > { %s158_s10 = sand.u32 1, %s2857_s14   ;;  %s2231_s25 = sshll.u32 %s2861_s15, 8 }
  0x44   : > { %s4016_s6 = scalar_select %p3012_p5, 1, 0 }
  0x45   : > { %s2146_s11 = sshll.u32 %s158_s10, 4  ;;  %s3025_s17 = scalar_lea.hbm %s3964_s0, %s2231_s25 }
  0x46   : > { %s162_s21 = scalar_lea.vmem [#allocation2], %s2146_s11  ;;  %p3029_p11 = pnand %p2390_p7, %p36_p9 }
  0x47   : > { %s170_s24 = sshll.u32 %s162_s21, 4  ;;  %s159_s27 = scalar_lea.sflag [#allocation3], %s158_s10  ;;  %s3027_s24 = int_to_ptr.vmem [resolvable:$true] %s170_s24 }
  0x48   : > { %s2761_s28 = scalar_lea.hbm %s3025_s17, 256  ;;  %p2763_p0 = pneg %p3029_p11 }
  0x49   : > { %p2762_p12 = scmp.ne.s32.totalorder %s3025_s17, %s2761_s28  ;;  %s2766_s30 = scalar_lea.hbm %s3964_s0, 512 }
  0x4a   : > { %p2767_p13 = scmp.lt.u32.totalorder %s3025_s17, %s3964_s0  ;;  %p2768_p6 = scmp.lt.u32.totalorder %s2766_s30, %s2761_s28 }
  0x4b   : > { %p2764_p2 = pnand %p2763_p0, %p2762_p12  ;;  %p2770_p3 = scmp.lt.u32.totalorder %s2761_s28, %s3025_s17 }
  0x4c   : > { %p2769_p10 = por %p2768_p6, %p2767_p13 }
  0x4d   : > { %p2765_p1 = pneg %p2764_p2 }
  0x4e   : > { %p2771_p7 = por %p2770_p3, %p2769_p10 }
  0x50   : > { %p2772_p9 = pnand %p2771_p7, %p2765_p1 }
  0x52   : > { %2775 = shalt.err (!%p2772_p9)
}
  0x53   : > { %s2776_s10 = scalar_lea.vmem %s3027_s24, 256  ;;  %s2867_s11 = smov [#allocation2]  }
  0x54   : > { %p2777_p12 = scmp.ne.s32.totalorder %s3027_s24, %s2776_s10  ;;  %s2781_s25 = sshll.u32 %s2867_s11, 4  ;;  %s2782_s25 = int_to_ptr.vmem [resolvable:$false] %s2781_s25 }
  0x55   : > { %s2783_s7 = scalar_lea.vmem %s2782_s25, 512  ;;  %p2784_p4 = scmp.lt.s32.totalorder %s3027_s24, %s2782_s25 }
  0x56   : > { %p2779_p2 = pnand %p2777_p12, %p2763_p0  ;;  %p2785_p13 = scmp.lt.s32.totalorder %s2783_s7, %s2776_s10 }
  0x58   : > { %p2780_p5 = pneg %p2779_p2  ;;  %p2786_p6 = por %p2785_p13, %p2784_p4 }
  0x5a   : > { %p2787_p10 = pnand %p2786_p6, %p2780_p5 }
  0x5c   : > { %2790 = shalt.err (!%p2787_p10)
}
  0x5d   : > { %2383 = dma.hbm_to_vmem [thread:$0]  (!%p3029_p11), %s3025_s17, 256, %s3027_s24, %s159_s27  }
  0x5e   : > { %179 = sbr.rel (%p2932_p8) target bundleno = 1708 (0x6ac), region = 32 }
  0x65   : > { %s3061_s8 = sand.u32 1, %s2853_s13   ;;  %p4018_p4 = scmp.ne.s32.totalorder %s4011_s18, 0 }
  0x66   : > { %s2150_s21 = sshll.u32 %s3061_s8, 4  ;;  %s182_s28 = scalar_lea.sflag [#allocation3], %s3061_s8 }
  0x67   : > { %s3067_s22 = scalar_lea.vmem [#allocation2], %s2150_s21 }
  0x68   : > { %2836 = dma.done.wait (%p4018_p4), %s182_s28, 256  }
  0x69   : > { %2838 = vsyncadd (%p4018_p4), %s182_s28, 4294967040  ;;  %p4019_p5 = scmp.eq.s32.totalorder %s2913_s16, 0 }
  0x6b   : > { %2840 = dma.done.wait (%p4019_p5), [#allocation6], 1280   ;;  %p4020_p8 = pmov %p4019_p5 }
  0x6c   : > { %v2868_v0 = vmov 0.0   ;;  %v2869_v1 = vmov 0   ;;  %v217_v2 = vld [vmem:[%s3067_s22 + $0x8] sm:$0xff]  ;;  %v216_v3 = vld [vmem:[%s3067_s22] sm:$0xff]  ;;  %vm248_vm0 = vcmask 64512   ;;  %vm511_vm1 = vcmask 1043456  }
  0x6d   : > { %2842 = vsyncadd (%p4020_p8), [#allocation6], 4294966016  ;;  %325 = vmatprep.mubr.f32.mxu0 %v2868_v0  ;;  %2433 = vset.pattern.permute.xlu0 %v2869_v1  ;;  %v224_v4 = vld [vmem:[#allocation5] sm:$0xff]  ;;  %v219_v6 = vld [vmem:[#allocation7 + $0x8] sm:$0xff]  ;;  %vm414_vm2 = vcmask 31744   ;;  %s2870_s18 = smov 124  }
  0x6e   : > { %582 = vmatprep.mubr.f32.mxu1 %v2868_v0  ;;  %261 = vmatprep.subr.mxu0 %v217_v2  ;;  %v218_v5 = vld [vmem:[#allocation7] sm:$0xff]  ;;  %v225_v7 = vld [vmem:[#allocation5 + $0x8] sm:$0xff]  ;;  %v226_v2 = vld [vmem:[#allocation5 + $0x10] sm:$0xff]  ;;  %vm1879_vm3 = vcmask 1042432   ;;  %vm2013_vm4 = vcmask 1041408   ;;  %s2232_s20 = sshll.u32 %s2913_s16, 8 }
  0x6f   : > { %262 = vmatpush1.msra.mxu0 %v216_v3  ;;  %230 = vperm.xlu0 %2433, %v218_v5   ;;  %s215_s17 = scalar_lea.vmem [#allocation8], %s2150_s21  ;;  %s3920_s29 = scalar_lea.hbm %s3967_s3, %s2232_s20 }
  0x70   : > { %2154 = vmatmul.mubr.msk.f32.vlgmr.msra.gmra.mrb[0].mxu0 %vm248_vm0, %v224_v4  ;;  %s2052_s24 = sshll.u32 %s215_s17, 4  ;;  %s2038_s16 = scalar_lea.sflag [#allocation4], %s3061_s8  ;;  %s3922_s24 = int_to_ptr.vmem [resolvable:$true] %s2052_s24 }
  0x71   : > { %331 = vmatprep.mubr.f32.mxu0 %v2868_v0  ;;  %s2791_s30 = scalar_lea.vmem %s3922_s24, 256  ;;  %p4106_p0 = scmp.ne.s32.totalorder %s4016_s6, 0 }
  0x72   : > { %p2792_p11 = scmp.ne.s32.totalorder %s3922_s24, %s2791_s30  ;;  %s2871_s23 = smov [#allocation8]  }
  0x73   : > { %235 = vperm.xlu0 %2433, %v219_v6   ;;  %s2795_s5 = sshll.u32 %s2871_s23, 4  ;;  %s2796_s5 = int_to_ptr.vmem [resolvable:$false] %s2795_s5 }
  0x74   : > { %2155 = vmatmul.mubr.msk.f32.gmra.mrb[2].mxu0 %vm248_vm0, %v225_v7  ;;  %p2793_p1 = pnand %p2792_p11, %p4106_p0  ;;  %s2797_s10 = scalar_lea.vmem %s2796_s5, 512 }
  0x75   : > { %337 = vmatprep.mubr.f32.mxu0 %v2868_v0  ;;  %p2798_p7 = scmp.lt.s32.totalorder %s3922_s24, %s2796_s5  ;;  %p2799_p9 = scmp.lt.s32.totalorder %s2797_s10, %s2791_s30 }
  0x76   : > { %p2794_p3 = pneg %p2793_p1 }
  0x77   : > { %p2800_p12 = por %p2799_p9, %p2798_p7 }
  0x78   : > { %2156 = vmatmul.mubr.msk.f32.gmra.mrb[4].mxu0 %vm248_vm0, %v226_v2 }
  0x79   : > { %343 = vmatprep.mubr.f32.mxu0 %v2868_v0  ;;  %p2801_p2 = pnand %p2800_p12, %p2794_p3 }
  0xee   : > { %v231_v8 = vpop.permute.xlu0 %230 }
  0xf2   : > { %v236_v13 = vpop.permute.xlu0 %235 }
 0x143   : > { %v327_v9 = vpop.f32.mrb[0].mxu0 }
 0x144   : > { %v329_v10 = vpop.f32.mrb[1].mxu0  ;;  %v328_v11 = vadd.f32 %v327_v9, %v231_v8 }
 0x145   : > { %v330_v18 = vadd.f32 %v329_v10, %v231_v8 }
 0x146   : > { %350 = vxpose.xlu1.b32.start.end [1/1] (short) %v328_v11, 128 }
 0x147   : > { %v333_v12 = vpop.f32.mrb[2].mxu0 }
 0x148   : > { %v335_v14 = vpop.f32.mrb[3].mxu0  ;;  %v334_v16 = vadd.f32 %v333_v12, %v236_v13 }
 0x149   : > { %v336_v15 = vadd.f32 %v335_v14, %v236_v13 }
 0x14a   : > { %v1260_v19 = vrot.slane %v334_v16, 4 }
 0x14b   : > { %v1261_v17 = vrot.slane %v336_v15, 4  ;;  %2158 = vmatprep.subr.msk.mxu1 %vm511_vm1, %v336_v15 }
 0x14c   : > { %2159 = vmatpush1.msk.msra.mxu1 %vm511_vm1, %v334_v16 }
 0x14d   : > { %2192 = vmatprep.subr.msk.mxu1 %vm511_vm1, %v1261_v17 }
 0x183   : > { %382 = vxpose.xlu1.b32.start.end [1/1] (short) %v330_v18, 128 }
 0x1a1   : > { %2434 = vset.pattern.permute.xlu1 %v2869_v1 }
 0x1c6   : > { %v366_v20 = vpop.trf.xlu1 }
 0x1c7   : > { %2160 = vmatmul.mubr.msk.f32.vlgmr.msra.gmra.mrb[0].mxu1 %vm414_vm2, %v366_v20  ;;  %1196 = vrot.lane.b32.xlu0 %v366_v20, %s2870_s18 }
 0x1c8   : > { %2193 = vmatpush1.msk.msra.mxu1 %vm511_vm1, %v1260_v19  ;;  %588 = vmatprep.mubr.f32.mxu1 %v2868_v0 }
 0x1ca   : > { %v367_v21 = vpop.trf.xlu1 }
 0x1cb   : > { %2161 = vmatmul.mubr.msk.f32.gmra.mrb[2].mxu1 %vm414_vm2, %v367_v21  ;;  %1198 = vrot.lane.b32.xlu0 %v367_v21, %s2870_s18 }
 0x1cc   : > { %594 = vmatprep.mubr.f32.mxu1 %v2868_v0 }
 0x1ce   : > { %v368_v22 = vpop.trf.xlu1 }
 0x1cf   : > { %2162 = vmatmul.mubr.msk.f32.gmra.mrb[4].mxu1 %vm414_vm2, %v368_v22  ;;  %1200 = vrot.lane.b32.xlu0 %v368_v22, %s2870_s18 }
 0x1d0   : > { %600 = vmatprep.mubr.f32.mxu1 %v2868_v0 }
 0x1d2   : > { %v369_v23 = vpop.trf.xlu1 }
 0x1d3   : > { %2163 = vmatmul.mubr.msk.f32.gmra.mrb[6].mxu1 %vm414_vm2, %v369_v23  ;;  %1202 = vrot.lane.b32.xlu0 %v369_v23, %s2870_s18 }
 0x1d4   : > { %606 = vmatprep.mubr.f32.mxu1 %v2868_v0 }
 0x1d6   : > { %v370_v24 = vpop.trf.xlu1 }
 0x1d7   : > { %2164 = vmatmul.mubr.msk.f32.gmra.mrb[8].mxu1 %vm414_vm2, %v370_v24  ;;  %1204 = vrot.lane.b32.xlu0 %v370_v24, %s2870_s18 }
 0x1d8   : > { %612 = vmatprep.mubr.f32.mxu1 %v2868_v0 }
 0x1da   : > { %v371_v25 = vpop.trf.xlu1 }
 0x1db   : > { %2165 = vmatmul.mubr.msk.f32.gmra.mrb[10].mxu1 %vm414_vm2, %v371_v25  ;;  %1206 = vrot.lane.b32.xlu0 %v371_v25, %s2870_s18 }
 0x1dc   : > { %618 = vmatprep.mubr.f32.mxu1 %v2868_v0 }
 0x1de   : > { %v372_v26 = vpop.trf.xlu1 }
 0x1df   : > { %2166 = vmatmul.mubr.msk.f32.gmra.mrb[12].mxu1 %vm414_vm2, %v372_v26  ;;  %1208 = vrot.lane.b32.xlu0 %v372_v26, %s2870_s18 }
 0x1e0   : > { %624 = vmatprep.mubr.f32.mxu1 %v2868_v0 }
 0x1e2   : > { %v373_v27 = vpop.trf.xlu1 }
 0x1e3   : > { %2167 = vmatmul.mubr.msk.f32.gmra.mrb[14].mxu1 %vm414_vm2, %v373_v27  ;;  %1210 = vrot.lane.b32.xlu0 %v373_v27, %s2870_s18 }
 0x1e4   : > { %630 = vmatprep.mubr.f32.mxu1 %v2868_v0 }
 0x1e6   : > { %v374_v28 = vpop.trf.xlu1 }
 0x1e7   : > { %2168 = vmatmul.mubr.msk.f32.gmra.mrb[16].mxu1 %vm414_vm2, %v374_v28  ;;  %1212 = vrot.lane.b32.xlu0 %v374_v28, %s2870_s18 }
 0x1e8   : > { %636 = vmatprep.mubr.f32.mxu1 %v2868_v0 }
 0x1ea   : > { %v375_v29 = vpop.trf.xlu1 }
 0x1eb   : > { %2169 = vmatmul.mubr.msk.f32.gmra.mrb[18].mxu1 %vm414_vm2, %v375_v29  ;;  %1214 = vrot.lane.b32.xlu0 %v375_v29, %s2870_s18 }
 0x1ec   : > { %642 = vmatprep.mubr.f32.mxu1 %v2868_v0 }
 0x1ee   : > { %v376_v30 = vpop.trf.xlu1 }
 0x1ef   : > { %2170 = vmatmul.mubr.msk.f32.gmra.mrb[20].mxu1 %vm414_vm2, %v376_v30  ;;  %1216 = vrot.lane.b32.xlu0 %v376_v30, %s2870_s18 }
 0x1f0   : > { %648 = vmatprep.mubr.f32.mxu1 %v2868_v0 }
 0x1f2   : > { %v377_v31 = vpop.trf.xlu1 }
 0x1f3   : > { %2171 = vmatmul.mubr.msk.f32.gmra.mrb[22].mxu1 %vm414_vm2, %v377_v31  ;;  %1218 = vrot.lane.b32.xlu0 %v377_v31, %s2870_s18 }
 0x1f4   : > { %654 = vmatprep.mubr.f32.mxu1 %v2868_v0 }
 0x1f6   : > { %v378_v32 = vpop.trf.xlu1 }
 0x1f7   : > { %2172 = vmatmul.mubr.msk.f32.gmra.mrb[24].mxu1 %vm414_vm2, %v378_v32  ;;  %1220 = vrot.lane.b32.xlu0 %v378_v32, %s2870_s18 }
 0x1f8   : > { %660 = vmatprep.mubr.f32.mxu1 %v2868_v0 }
 0x1fa   : > { %v379_v33 = vpop.trf.xlu1 }
 0x1fb   : > { %2173 = vmatmul.mubr.msk.f32.gmra.mrb[26].mxu1 %vm414_vm2, %v379_v33  ;;  %1222 = vrot.lane.b32.xlu0 %v379_v33, %s2870_s18 }
 0x1fc   : > { %666 = vmatprep.mubr.f32.mxu1 %v2868_v0 }
 0x1fe   : > { %v380_v34 = vpop.trf.xlu1 }
 0x1ff   : > { %2174 = vmatmul.mubr.msk.f32.gmra.mrb[28].mxu1 %vm414_vm2, %v380_v34  ;;  %1224 = vrot.lane.b32.xlu0 %v380_v34, %s2870_s18 }
 0x200   : > { %672 = vmatprep.mubr.f32.mxu1 %v2868_v0 }
 0x202   : > { %v381_v35 = vpop.trf.xlu1 }
 0x203   : > { %2175 = vmatmul.mubr.msk.f32.gmra.mrb[30].mxu1 %vm414_vm2, %v381_v35  ;;  %1226 = vrot.lane.b32.xlu1 %v381_v35, %s2870_s18 }
 0x204   : > { %678 = vmatprep.mubr.f32.mxu1 %v2868_v0 }
 0x206   : > { %v398_v36 = vpop.trf.xlu1 }
 0x207   : > { %2176 = vmatmul.mubr.msk.f32.gmra.mrb[32].mxu1 %vm414_vm2, %v398_v36  ;;  %1228 = vrot.lane.b32.xlu0 %v398_v36, %s2870_s18 }
 0x208   : > { %684 = vmatprep.mubr.f32.mxu1 %v2868_v0 }
 0x20a   : > { %v399_v37 = vpop.trf.xlu1 }
 0x20b   : > { %2177 = vmatmul.mubr.msk.f32.gmra.mrb[34].mxu1 %vm414_vm2, %v399_v37  ;;  %1230 = vrot.lane.b32.xlu0 %v399_v37, %s2870_s18 }
 0x20c   : > { %690 = vmatprep.mubr.f32.mxu1 %v2868_v0 }
 0x20e   : > { %v400_v38 = vpop.trf.xlu1 }
 0x20f   : > { %2178 = vmatmul.mubr.msk.f32.gmra.mrb[36].mxu1 %vm414_vm2, %v400_v38  ;;  %1232 = vrot.lane.b32.xlu0 %v400_v38, %s2870_s18 }
 0x210   : > { %696 = vmatprep.mubr.f32.mxu1 %v2868_v0 }
 0x212   : > { %v401_v39 = vpop.trf.xlu1 }
 0x213   : > { %2179 = vmatmul.mubr.msk.f32.gmra.mrb[38].mxu1 %vm414_vm2, %v401_v39  ;;  %1234 = vrot.lane.b32.xlu0 %v401_v39, %s2870_s18 }
 0x214   : > { %702 = vmatprep.mubr.f32.mxu1 %v2868_v0 }
 0x216   : > { %v402_v40 = vpop.trf.xlu1 }
 0x217   : > { %2180 = vmatmul.mubr.msk.f32.gmra.mrb[40].mxu1 %vm414_vm2, %v402_v40  ;;  %1236 = vrot.lane.b32.xlu0 %v402_v40, %s2870_s18 }
 0x218   : > { %708 = vmatprep.mubr.f32.mxu1 %v2868_v0 }
 0x21a   : > { %v403_v41 = vpop.trf.xlu1 }
 0x21b   : > { %2181 = vmatmul.mubr.msk.f32.gmra.mrb[42].mxu1 %vm414_vm2, %v403_v41  ;;  %1238 = vrot.lane.b32.xlu0 %v403_v41, %s2870_s18 }
 0x21c   : > { %714 = vmatprep.mubr.f32.mxu1 %v2868_v0 }
 0x21e   : > { %v404_v42 = vpop.trf.xlu1 }
 0x21f   : > { %2182 = vmatmul.mubr.msk.f32.gmra.mrb[44].mxu1 %vm414_vm2, %v404_v42  ;;  %1240 = vrot.lane.b32.xlu0 %v404_v42, %s2870_s18 }
 0x220   : > { %720 = vmatprep.mubr.f32.mxu1 %v2868_v0 }
 0x222   : > { %v405_v43 = vpop.trf.xlu1 }
 0x223   : > { %2183 = vmatmul.mubr.msk.f32.gmra.mrb[46].mxu1 %vm414_vm2, %v405_v43  ;;  %1242 = vrot.lane.b32.xlu0 %v405_v43, %s2870_s18 }
 0x224   : > { %726 = vmatprep.mubr.f32.mxu1 %v2868_v0 }
 0x226   : > { %v406_v44 = vpop.trf.xlu1 }
 0x227   : > { %2184 = vmatmul.mubr.msk.f32.gmra.mrb[48].mxu1 %vm414_vm2, %v406_v44  ;;  %1244 = vrot.lane.b32.xlu0 %v406_v44, %s2870_s18 }
 0x228   : > { %732 = vmatprep.mubr.f32.mxu1 %v2868_v0 }
 0x22a   : > { %v407_v45 = vpop.trf.xlu1 }
 0x22b   : > { %2185 = vmatmul.mubr.msk.f32.gmra.mrb[50].mxu1 %vm414_vm2, %v407_v45  ;;  %1246 = vrot.lane.b32.xlu0 %v407_v45, %s2870_s18 }
 0x22c   : > { %738 = vmatprep.mubr.f32.mxu1 %v2868_v0 }
 0x22e   : > { %v408_v46 = vpop.trf.xlu1 }
 0x22f   : > { %2186 = vmatmul.mubr.msk.f32.gmra.mrb[52].mxu1 %vm414_vm2, %v408_v46  ;;  %1248 = vrot.lane.b32.xlu0 %v408_v46, %s2870_s18 }
 0x230   : > { %744 = vmatprep.mubr.f32.mxu1 %v2868_v0 }
 0x232   : > { %v409_v47 = vpop.trf.xlu1 }
 0x233   : > { %2187 = vmatmul.mubr.msk.f32.gmra.mrb[54].mxu1 %vm414_vm2, %v409_v47  ;;  %1250 = vrot.lane.b32.xlu0 %v409_v47, %s2870_s18 }
 0x234   : > { %750 = vmatprep.mubr.f32.mxu1 %v2868_v0 }
 0x236   : > { %v410_v48 = vpop.trf.xlu1 }
 0x237   : > { %2188 = vmatmul.mubr.msk.f32.gmra.mrb[56].mxu1 %vm414_vm2, %v410_v48  ;;  %1252 = vrot.lane.b32.xlu0 %v410_v48, %s2870_s18 }
 0x238   : > { %756 = vmatprep.mubr.f32.mxu1 %v2868_v0 }
 0x239   : > { %v1197_v49 = vpop.permute.xlu0 %1196 }
 0x23a   : > { %v411_v50 = vpop.trf.xlu1 }
 0x23b   : > { %2189 = vmatmul.mubr.msk.f32.gmra.mrb[58].mxu1 %vm414_vm2, %v411_v50  ;;  %1254 = vrot.lane.b32.xlu0 %v411_v50, %s2870_s18 }
 0x23c   : > { %762 = vmatprep.mubr.f32.mxu1 %v2868_v0 }
 0x23d   : > { %v1199_v51 = vpop.permute.xlu0 %1198 }
 0x23e   : > { %v412_v52 = vpop.trf.xlu1 }
 0x23f   : > { %2190 = vmatmul.mubr.msk.f32.gmra.mrb[60].mxu1 %vm414_vm2, %v412_v52  ;;  %1256 = vrot.lane.b32.xlu0 %v412_v52, %s2870_s18 }
 0x240   : > { %768 = vmatprep.mubr.f32.mxu1 %v2868_v0 }
 0x241   : > { %v1201_v53 = vpop.permute.xlu0 %1200 }
 0x242   : > { %v413_v54 = vpop.trf.xlu1 }
 0x243   : > { %2191 = vmatmul.mubr.msk.f32.gmra.mrb[62].mxu1 %vm414_vm2, %v413_v54  ;;  %1258 = vrot.lane.b32.xlu0 %v413_v54, %s2870_s18 }
 0x244   : > { %1394 = vmatprep.mubr.f32.mxu1 %v2868_v0 }
 0x245   : > { %v1203_v55 = vpop.permute.xlu0 %1202 }
 0x247   : > { %2194 = vmatmul.mubr.msk.f32.vlgmr.msra.gmra.mrb[64].mxu1 %vm414_vm2, %v1197_v49 }
 0x248   : > { %1400 = vmatprep.mubr.f32.mxu1 %v2868_v0 }
 0x249   : > { %v1205_v56 = vpop.permute.xlu0 %1204 }
 0x24b   : > { %2195 = vmatmul.mubr.msk.f32.gmra.mrb[66].mxu1 %vm414_vm2, %v1199_v51 }
 0x24c   : > { %1406 = vmatprep.mubr.f32.mxu1 %v2868_v0 }
 0x24d   : > { %v1207_v57 = vpop.permute.xlu0 %1206 }
 0x24f   : > { %2196 = vmatmul.mubr.msk.f32.gmra.mrb[68].mxu1 %vm414_vm2, %v1201_v53 }
 0x250   : > { %1412 = vmatprep.mubr.f32.mxu1 %v2868_v0 }
 0x251   : > { %v1209_v58 = vpop.permute.xlu0 %1208 }
 0x253   : > { %2197 = vmatmul.mubr.msk.f32.gmra.mrb[70].mxu1 %vm414_vm2, %v1203_v55 }
 0x254   : > { %1418 = vmatprep.mubr.f32.mxu1 %v2868_v0 }
 0x255   : > { %v1211_v59 = vpop.permute.xlu0 %1210 }
 0x257   : > { %2198 = vmatmul.mubr.msk.f32.gmra.mrb[72].mxu1 %vm414_vm2, %v1205_v56 }
 0x258   : > { %1424 = vmatprep.mubr.f32.mxu1 %v2868_v0 }
 0x259   : > { %v1213_v60 = vpop.permute.xlu0 %1212 }
 0x25b   : > { %2199 = vmatmul.mubr.msk.f32.gmra.mrb[74].mxu1 %vm414_vm2, %v1207_v57 }
 0x25c   : > { %1430 = vmatprep.mubr.f32.mxu1 %v2868_v0 }
 0x25d   : > { %v1215_v61 = vpop.permute.xlu0 %1214 }
 0x25f   : > { %2200 = vmatmul.mubr.msk.f32.gmra.mrb[76].mxu1 %vm414_vm2, %v1209_v58 }
 0x260   : > { %1436 = vmatprep.mubr.f32.mxu1 %v2868_v0 }
 0x261   : > { %v1217_v62 = vpop.permute.xlu0 %1216 }
 0x263   : > { %2201 = vmatmul.mubr.msk.f32.gmra.mrb[78].mxu1 %vm414_vm2, %v1211_v59 }
 0x264   : > { %1442 = vmatprep.mubr.f32.mxu1 %v2868_v0 }
 0x265   : > { %v1219_v63 = vpop.permute.xlu0 %1218 }
 0x267   : > { %2202 = vmatmul.mubr.msk.f32.gmra.mrb[80].mxu1 %vm414_vm2, %v1213_v60 }
 0x268   : > { %1448 = vmatprep.mubr.f32.mxu1 %v2868_v0 }
 0x269   : > { %v1221_v1 = vpop.permute.xlu0 %1220 }
 0x26b   : > { %2203 = vmatmul.mubr.msk.f32.gmra.mrb[82].mxu1 %vm414_vm2, %v1215_v61 }
 0x26c   : > { %1454 = vmatprep.mubr.f32.mxu1 %v2868_v0 }
 0x26d   : > { %v1223_v3 = vpop.permute.xlu0 %1222 }
 0x26f   : > { %2204 = vmatmul.mubr.msk.f32.gmra.mrb[84].mxu1 %vm414_vm2, %v1217_v62 }
 0x270   : > { %1460 = vmatprep.mubr.f32.mxu1 %v2868_v0 }
 0x271   : > { %v1225_v4 = vpop.permute.xlu0 %1224 }
 0x273   : > { %2205 = vmatmul.mubr.msk.f32.gmra.mrb[86].mxu1 %vm414_vm2, %v1219_v63 }
 0x274   : > { %1466 = vmatprep.mubr.f32.mxu1 %v2868_v0 }
 0x275   : > { %v1227_v8 = vpop.permute.xlu1 %1226 }
 0x277   : > { %2206 = vmatmul.mubr.msk.f32.gmra.mrb[88].mxu1 %vm414_vm2, %v1221_v1 }
 0x278   : > { %1472 = vmatprep.mubr.f32.mxu1 %v2868_v0 }
 0x279   : > { %v1229_v5 = vpop.permute.xlu0 %1228 }
 0x27b   : > { %2207 = vmatmul.mubr.msk.f32.gmra.mrb[90].mxu1 %vm414_vm2, %v1223_v3  ;;  %v227_v3 = vld [vmem:[#allocation5 + $0x18] sm:$0x3] }
 0x27c   : > { %1478 = vmatprep.mubr.f32.mxu1 %v2868_v0  ;;  %2157 = vmatmul.mubr.msk.f32.gmra.mrb[6].mxu0 %vm248_vm0, %v227_v3 }
 0x27d   : > { %v1231_v6 = vpop.permute.xlu0 %1230 }
 0x27f   : > { %2208 = vmatmul.mubr.msk.f32.gmra.mrb[92].mxu1 %vm414_vm2, %v1225_v4 }
 0x280   : > { %1484 = vmatprep.mubr.f32.mxu1 %v2868_v0 }
 0x281   : > { %v1233_v7 = vpop.permute.xlu0 %1232 }
 0x283   : > { %2209 = vmatmul.mubr.msk.f32.gmra.mrb[94].mxu1 %vm414_vm2, %v1227_v8 }
 0x284   : > { %1490 = vmatprep.mubr.f32.mxu1 %v2868_v0 }
 0x285   : > { %v1235_v9 = vpop.permute.xlu0 %1234 }
 0x287   : > { %2210 = vmatmul.mubr.msk.f32.gmra.mrb[96].mxu1 %vm414_vm2, %v1229_v5 }
 0x288   : > { %1496 = vmatprep.mubr.f32.mxu1 %v2868_v0 }
 0x289   : > { %v1237_v10 = vpop.permute.xlu0 %1236 }
 0x28b   : > { %2211 = vmatmul.mubr.msk.f32.gmra.mrb[98].mxu1 %vm414_vm2, %v1231_v6 }
 0x28c   : > { %1502 = vmatprep.mubr.f32.mxu1 %v2868_v0 }
 0x28d   : > { %v1239_v11 = vpop.permute.xlu0 %1238 }
 0x28f   : > { %2212 = vmatmul.mubr.msk.f32.gmra.mrb[100].mxu1 %vm414_vm2, %v1233_v7 }
 0x290   : > { %1508 = vmatprep.mubr.f32.mxu1 %v2868_v0 }
 0x291   : > { %v1241_v12 = vpop.permute.xlu0 %1240 }
 0x293   : > { %2213 = vmatmul.mubr.msk.f32.gmra.mrb[102].mxu1 %vm414_vm2, %v1235_v9 }
 0x294   : > { %1514 = vmatprep.mubr.f32.mxu1 %v2868_v0 }
 0x295   : > { %v1243_v13 = vpop.permute.xlu0 %1242 }
 0x297   : > { %2214 = vmatmul.mubr.msk.f32.gmra.mrb[104].mxu1 %vm414_vm2, %v1237_v10 }
 0x298   : > { %1520 = vmatprep.mubr.f32.mxu1 %v2868_v0 }
 0x299   : > { %v1245_v14 = vpop.permute.xlu0 %1244 }
 0x29a   : > { %v3229_v15 = vpop.f32.mrb[0].mxu1 }
 0x29b   : > { %v3231_v16 = vpop.f32.mrb[1].mxu1  ;;  %2215 = vmatmul.mubr.msk.f32.gmra.mrb[106].mxu1 %vm414_vm2, %v1239_v11 }
 0x29c   : > { %v775_v17 = vmax.f32 %v3229_v15, %v3231_v16  ;;  %1526 = vmatprep.mubr.f32.mxu1 %v2868_v0 }
 0x29d   : > { %v1247_v18 = vpop.permute.xlu0 %1246 }
 0x29e   : > { %v3237_v19 = vpop.f32.mrb[2].mxu1  ;;  %776 = vmax.xlane.f32.xlu0 %v775_v17 }
 0x29f   : > { %v3239_v20 = vpop.f32.mrb[3].mxu1  ;;  %2216 = vmatmul.mubr.msk.f32.gmra.mrb[108].mxu1 %vm414_vm2, %v1241_v12 }
 0x2a0   : > { %v778_v21 = vmax.f32 %v3237_v19, %v3239_v20  ;;  %1532 = vmatprep.mubr.f32.mxu1 %v2868_v0 }
 0x2a1   : > { %v1249_v24 = vpop.permute.xlu0 %1248 }
 0x2a2   : > { %v3245_v22 = vpop.f32.mrb[4].mxu1  ;;  %779 = vmax.xlane.f32.xlu1 %v778_v21 }
 0x2a3   : > { %v3247_v23 = vpop.f32.mrb[5].mxu1  ;;  %2217 = vmatmul.mubr.msk.f32.gmra.mrb[110].mxu1 %vm414_vm2, %v1243_v13 }
 0x2a4   : > { %v781_v25 = vmax.f32 %v3245_v22, %v3247_v23  ;;  %1538 = vmatprep.mubr.f32.mxu1 %v2868_v0 }
 0x2a5   : > { %v1251_v29 = vpop.permute.xlu0 %1250 }
 0x2a6   : > { %v3253_v26 = vpop.f32.mrb[6].mxu1  ;;  %782 = vmax.xlane.f32.xlu0 %v781_v25 }
 0x2a7   : > { %v3255_v27 = vpop.f32.mrb[7].mxu1  ;;  %2218 = vmatmul.mubr.msk.f32.gmra.mrb[112].mxu1 %vm414_vm2, %v1245_v14 }
 0x2a8   : > { %v784_v28 = vmax.f32 %v3253_v26, %v3255_v27  ;;  %1544 = vmatprep.mubr.f32.mxu1 %v2868_v0 }
 0x2a9   : > { %v1253_v35 = vpop.permute.xlu0 %1252 }
 0x2aa   : > { %v3261_v30 = vpop.f32.mrb[8].mxu1  ;;  %785 = vmax.xlane.f32.xlu0 %v784_v28 }
 0x2ab   : > { %v3263_v31 = vpop.f32.mrb[9].mxu1  ;;  %2219 = vmatmul.mubr.msk.f32.gmra.mrb[114].mxu1 %vm414_vm2, %v1247_v18 }
 0x2ac   : > { %v787_v32 = vmax.f32 %v3261_v30, %v3263_v31  ;;  %1550 = vmatprep.mubr.f32.mxu1 %v2868_v0 }
 0x2ad   : > { %v1255_v40 = vpop.permute.xlu0 %1254 }
 0x2ae   : > { %v3269_v33 = vpop.f32.mrb[10].mxu1  ;;  %788 = vmax.xlane.f32.xlu0 %v787_v32 }
 0x2af   : > { %v3271_v34 = vpop.f32.mrb[11].mxu1  ;;  %2220 = vmatmul.mubr.msk.f32.gmra.mrb[116].mxu1 %vm414_vm2, %v1249_v24 }
 0x2b0   : > { %v790_v36 = vmax.f32 %v3269_v33, %v3271_v34  ;;  %1556 = vmatprep.mubr.f32.mxu1 %v2868_v0 }
 0x2b1   : > { %v1257_v46 = vpop.permute.xlu0 %1256 }
 0x2b2   : > { %v3277_v37 = vpop.f32.mrb[12].mxu1  ;;  %791 = vmax.xlane.f32.xlu0 %v790_v36 }
 0x2b3   : > { %v3279_v38 = vpop.f32.mrb[13].mxu1  ;;  %2221 = vmatmul.mubr.msk.f32.gmra.mrb[118].mxu1 %vm414_vm2, %v1251_v29 }
 0x2b4   : > { %v793_v39 = vmax.f32 %v3277_v37, %v3279_v38  ;;  %1562 = vmatprep.mubr.f32.mxu1 %v2868_v0 }
 0x2b5   : > { %v1259_v51 = vpop.permute.xlu0 %1258 }
 0x2b6   : > { %v3285_v41 = vpop.f32.mrb[14].mxu1  ;;  %794 = vmax.xlane.f32.xlu0 %v793_v39 }
 0x2b7   : > { %v3287_v42 = vpop.f32.mrb[15].mxu1  ;;  %2222 = vmatmul.mubr.msk.f32.gmra.mrb[120].mxu1 %vm414_vm2, %v1253_v35 }
 0x2b8   : > { %v796_v43 = vmax.f32 %v3285_v41, %v3287_v42  ;;  %1568 = vmatprep.mubr.f32.mxu1 %v2868_v0 }
 0x2ba   : > { %v3293_v44 = vpop.f32.mrb[16].mxu1  ;;  %797 = vmax.xlane.f32.xlu0 %v796_v43 }
 0x2bb   : > { %v3295_v45 = vpop.f32.mrb[17].mxu1  ;;  %2223 = vmatmul.mubr.msk.f32.gmra.mrb[122].mxu1 %vm414_vm2, %v1255_v40 }
 0x2bc   : > { %v799_v47 = vmax.f32 %v3293_v44, %v3295_v45  ;;  %1574 = vmatprep.mubr.f32.mxu1 %v2868_v0 }
 0x2be   : > { %v3301_v48 = vpop.f32.mrb[18].mxu1  ;;  %800 = vmax.xlane.f32.xlu0 %v799_v47 }
 0x2bf   : > { %v3303_v49 = vpop.f32.mrb[19].mxu1  ;;  %2224 = vmatmul.mubr.msk.f32.gmra.mrb[124].mxu1 %vm414_vm2, %v1257_v46 }
 0x2c0   : > { %v802_v50 = vmax.f32 %v3301_v48, %v3303_v49  ;;  %1580 = vmatprep.mubr.f32.mxu1 %v2868_v0 }
 0x2c2   : > { %v3309_v52 = vpop.f32.mrb[20].mxu1  ;;  %803 = vmax.xlane.f32.xlu0 %v802_v50 }
 0x2c3   : > { %v3311_v53 = vpop.f32.mrb[21].mxu1  ;;  %2225 = vmatmul.mubr.msk.f32.gmra.mrb[126].mxu1 %vm414_vm2, %v1259_v51 }
 0x2c4   : > { %v805_v54 = vmax.f32 %v3309_v52, %v3311_v53 }
 0x2c6   : > { %v3316_v55 = vpop.f32.mrb[22].mxu1  ;;  %806 = vmax.xlane.f32.xlu1 %v805_v54 }
 0x2c7   : > { %v3318_v56 = vpop.f32.mrb[23].mxu1 }
 0x2c8   : > { %v808_v57 = vmax.f32 %v3316_v55, %v3318_v56 }
 0x2ca   : > { %v3322_v0 = vpop.f32.mrb[24].mxu1  ;;  %809 = vmax.xlane.f32.xlu0 %v808_v57 }
 0x2cb   : > { %v3324_v58 = vpop.f32.mrb[25].mxu1 }
 0x2cc   : > { %v811_v59 = vmax.f32 %v3322_v0, %v3324_v58 }
 0x2ce   : > { %v3328_v60 = vpop.f32.mrb[26].mxu1  ;;  %812 = vmax.xlane.f32.xlu1 %v811_v59 }
 0x2cf   : > { %v3330_v61 = vpop.f32.mrb[27].mxu1 }
 0x2d0   : > { %v814_v62 = vmax.f32 %v3328_v60, %v3330_v61 }
 0x2d2   : > { %v3334_v63 = vpop.f32.mrb[28].mxu1  ;;  %815 = vmax.xlane.f32.xlu0 %v814_v62 }
 0x2d3   : > { %v3336_v1 = vpop.f32.mrb[29].mxu1 }
 0x2d4   : > { %v817_v2 = vmax.f32 %v3334_v63, %v3336_v1 }
 0x2d6   : > { %v3341_v4 = vpop.f32.mrb[30].mxu1  ;;  %818 = vmax.xlane.f32.xlu1 %v817_v2 }
 0x2d7   : > { %v3343_v5 = vpop.f32.mrb[31].mxu1 }
 0x2d8   : > { %v820_v6 = vmax.f32 %v3341_v4, %v3343_v5 }
 0x2da   : > { %v3347_v7 = vpop.f32.mrb[32].mxu1  ;;  %821 = vmax.xlane.f32.xlu0 %v820_v6 }
 0x2db   : > { %v3349_v8 = vpop.f32.mrb[33].mxu1 }
 0x2dc   : > { %v823_v9 = vmax.f32 %v3347_v7, %v3349_v8 }
 0x2de   : > { %824 = vmax.xlane.f32.xlu1 %v823_v9  ;;  %v3353_v10 = vpop.f32.mrb[34].mxu1 }
 0x2df   : > { %v3355_v11 = vpop.f32.mrb[35].mxu1 }
 0x2e0   : > { %v826_v12 = vmax.f32 %v3353_v10, %v3355_v11 }
 0x2e2   : > { %v3359_v13 = vpop.f32.mrb[36].mxu1  ;;  %827 = vmax.xlane.f32.xlu0 %v826_v12 }
 0x2e3   : > { %v3361_v14 = vpop.f32.mrb[37].mxu1 }
 0x2e4   : > { %v829_v17 = vmax.f32 %v3359_v13, %v3361_v14 }
 0x2e6   : > { %830 = vmax.xlane.f32.xlu1 %v829_v17  ;;  %v3365_v18 = vpop.f32.mrb[38].mxu1 }
 0x2e7   : > { %v3367_v21 = vpop.f32.mrb[39].mxu1 }
 0x2e8   : > { %v832_v24 = vmax.f32 %v3365_v18, %v3367_v21 }
 0x2ea   : > { %v3371_v25 = vpop.f32.mrb[40].mxu1  ;;  %833 = vmax.xlane.f32.xlu0 %v832_v24 }
 0x2eb   : > { %v3373_v28 = vpop.f32.mrb[41].mxu1 }
 0x2ec   : > { %v835_v29 = vmax.f32 %v3371_v25, %v3373_v28 }
 0x2ee   : > { %836 = vmax.xlane.f32.xlu1 %v835_v29  ;;  %v3377_v32 = vpop.f32.mrb[42].mxu1 }
 0x2ef   : > { %v3379_v35 = vpop.f32.mrb[43].mxu1 }
 0x2f0   : > { %v838_v36 = vmax.f32 %v3377_v32, %v3379_v35 }
 0x2f2   : > { %v3383_v39 = vpop.f32.mrb[44].mxu1  ;;  %839 = vmax.xlane.f32.xlu0 %v838_v36 }
 0x2f3   : > { %v3385_v40 = vpop.f32.mrb[45].mxu1 }
 0x2f4   : > { %v841_v43 = vmax.f32 %v3383_v39, %v3385_v40 }
 0x2f6   : > { %842 = vmax.xlane.f32.xlu1 %v841_v43  ;;  %v3389_v46 = vpop.f32.mrb[46].mxu1 }
 0x2f7   : > { %v3391_v47 = vpop.f32.mrb[47].mxu1 }
 0x2f8   : > { %v844_v50 = vmax.f32 %v3389_v46, %v3391_v47 }
 0x2fa   : > { %v3395_v51 = vpop.f32.mrb[48].mxu1  ;;  %845 = vmax.xlane.f32.xlu0 %v844_v50 }
 0x2fb   : > { %v3397_v54 = vpop.f32.mrb[49].mxu1 }
 0x2fc   : > { %4021 = vst [vmem:[#allocation12_spill] sm:$0xff] %v3397_v54  ;;  %v847_v57 = vmax.f32 %v3395_v51, %v3397_v54 }
 0x2fe   : > { %848 = vmax.xlane.f32.xlu1 %v847_v57  ;;  %v3401_v59 = vpop.f32.mrb[50].mxu1 }
 0x2ff   : > { %4022 = vst [vmem:[#allocation13_spill] sm:$0xff] %v3401_v59  ;;  %v3403_v62 = vpop.f32.mrb[51].mxu1 }
 0x300   : > { %4023 = vst [vmem:[#allocation14_spill] sm:$0xff] %v3403_v62  ;;  %v850_v2 = vmax.f32 %v3401_v59, %v3403_v62 }
 0x302   : > { %v3407_v3 = vpop.f32.mrb[52].mxu1  ;;  %851 = vmax.xlane.f32.xlu0 %v850_v2 }
 0x303   : > { %4024 = vst [vmem:[#allocation15_spill] sm:$0xff] %v3407_v3  ;;  %v3409_v6 = vpop.f32.mrb[53].mxu1 }
 0x304   : > { %4025 = vst [vmem:[#allocation16_spill] sm:$0xff] %v3409_v6  ;;  %v853_v9 = vmax.f32 %v3407_v3, %v3409_v6 }
 0x306   : > { %854 = vmax.xlane.f32.xlu1 %v853_v9  ;;  %v3413_v12 = vpop.f32.mrb[54].mxu1 }
 0x307   : > { %4026 = vst [vmem:[#allocation17_spill] sm:$0xff] %v3413_v12  ;;  %v3415_v17 = vpop.f32.mrb[55].mxu1 }
 0x308   : > { %4027 = vst [vmem:[#allocation18_spill] sm:$0xff] %v3415_v17  ;;  %v856_v24 = vmax.f32 %v3413_v12, %v3415_v17 }
 0x30a   : > { %v3419_v29 = vpop.f32.mrb[56].mxu1  ;;  %857 = vmax.xlane.f32.xlu0 %v856_v24 }
 0x30b   : > { %4028 = vst [vmem:[#allocation19_spill] sm:$0xff] %v3419_v29  ;;  %v3421_v36 = vpop.f32.mrb[57].mxu1 }
 0x30c   : > { %4029 = vst [vmem:[#allocation20_spill] sm:$0xff] %v3421_v36  ;;  %v859_v43 = vmax.f32 %v3419_v29, %v3421_v36 }
 0x30e   : > { %860 = vmax.xlane.f32.xlu1 %v859_v43  ;;  %v3425_v50 = vpop.f32.mrb[58].mxu1 }
 0x30f   : > { %4030 = vst [vmem:[#allocation21_spill] sm:$0xff] %v3425_v50  ;;  %v3427_v57 = vpop.f32.mrb[59].mxu1 }
 0x310   : > { %4031 = vst [vmem:[#allocation22_spill] sm:$0xff] %v3427_v57  ;;  %v862_v2 = vmax.f32 %v3425_v50, %v3427_v57 }
 0x312   : > { %v3431_v9 = vpop.f32.mrb[60].mxu1  ;;  %863 = vmax.xlane.f32.xlu0 %v862_v2 }
 0x313   : > { %4032 = vst [vmem:[#allocation23_spill] sm:$0xff] %v3431_v9  ;;  %v3433_v17 = vpop.f32.mrb[61].mxu1 }
 0x314   : > { %4033 = vst [vmem:[#allocation24_spill] sm:$0xff] %v3433_v17  ;;  %v865_v24 = vmax.f32 %v3431_v9, %v3433_v17 }
 0x316   : > { %866 = vmax.xlane.f32.xlu1 %v865_v24  ;;  %v3437_v12 = vpop.f32.mrb[62].mxu1 }
 0x317   : > { %4034 = vst [vmem:[#allocation25_spill] sm:$0xff] %v3437_v12  ;;  %v3439_v36 = vpop.f32.mrb[63].mxu1 }
 0x318   : > { %4035 = vst [vmem:[#allocation26_spill] sm:$0xff] %v3439_v36  ;;  %v868_v43 = vmax.f32 %v3437_v12, %v3439_v36 }
 0x31a   : > { %v3443_v29 = vpop.f32.mrb[64].mxu1  ;;  %869 = vmax.xlane.f32.xlu0 %v868_v43 }
 0x31b   : > { %4036 = vst [vmem:[#allocation27_spill] sm:$0xff] %v3443_v29  ;;  %v3445_v57 = vpop.f32.mrb[65].mxu1 }
 0x31c   : > { %4037 = vst [vmem:[#allocation28_spill] sm:$0xff] %v3445_v57  ;;  %v1587_v2 = vmax.f32 %v3443_v29, %v3445_v57 }
 0x31e   : > { %1588 = vmax.xlane.f32.xlu1 %v1587_v2  ;;  %v3449_v50 = vpop.f32.mrb[66].mxu1 }
 0x31f   : > { %4038 = vst [vmem:[#allocation29_spill] sm:$0xff] %v3449_v50  ;;  %v3451_v17 = vpop.f32.mrb[67].mxu1 }
 0x320   : > { %4039 = vst [vmem:[#allocation30_spill] sm:$0xff] %v3451_v17  ;;  %v1590_v24 = vmax.f32 %v3449_v50, %v3451_v17 }
 0x322   : > { %v3455_v9 = vpop.f32.mrb[68].mxu1  ;;  %1591 = vmax.xlane.f32.xlu0 %v1590_v24 }
 0x323   : > { %4040 = vst [vmem:[#allocation31_spill] sm:$0xff] %v3455_v9  ;;  %v3457_v36 = vpop.f32.mrb[69].mxu1 }
 0x324   : > { %4041 = vst [vmem:[#allocation32_spill] sm:$0xff] %v3457_v36  ;;  %v1593_v43 = vmax.f32 %v3455_v9, %v3457_v36 }
 0x326   : > { %1594 = vmax.xlane.f32.xlu1 %v1593_v43  ;;  %v3461_v12 = vpop.f32.mrb[70].mxu1 }
 0x327   : > { %4042 = vst [vmem:[#allocation33_spill] sm:$0xff] %v3461_v12  ;;  %v3463_v57 = vpop.f32.mrb[71].mxu1 }
 0x328   : > { %4043 = vst [vmem:[#allocation34_spill] sm:$0xff] %v3463_v57  ;;  %v1596_v2 = vmax.f32 %v3461_v12, %v3463_v57 }
 0x32a   : > { %v3467_v29 = vpop.f32.mrb[72].mxu1  ;;  %1597 = vmax.xlane.f32.xlu0 %v1596_v2 }
 0x32b   : > { %v3469_v17 = vpop.f32.mrb[73].mxu1  ;;  %v777_v50 = vpop.xlane.xlu0 %776 }
 0x32c   : > { %4044 = vst [vmem:[#allocation35_spill] sm:$0xff] %v3469_v17  ;;  %v871_v24 = vsub.f32 %v3229_v15, %v777_v50  ;;  %v1599_v6 = vmax.f32 %v3467_v29, %v3469_v17  ;;  %v872_v43 = vsub.f32 %v3231_v16, %v777_v50 }
 0x32e   : > { %1600 = vmax.xlane.f32.xlu1 %v1599_v6  ;;  %v3475_v36 = vpop.f32.mrb[74].mxu1  ;;  %v935_v9 = vmul.f32 1.442695, %v871_v24  ;;  %v937_v15 = vmul.f32 1.442695, %v872_v43 }
 0x32f   : > { %v3477_v3 = vpop.f32.mrb[75].mxu1  ;;  %v780_v57 = vpop.xlane.xlu1 %779 }
 0x330   : > { %v1602_v2 = vmax.f32 %v3475_v36, %v3477_v3  ;;  %v873_v12 = vsub.f32 %v3237_v19, %v780_v57  ;;  %v874_v62 = vsub.f32 %v3239_v20, %v780_v57  ;;  %2435 = vpow2.f32 %v935_v9 }
 0x332   : > { %v939_v59 = vmul.f32 1.442695, %v873_v12  ;;  %v941_v54 = vmul.f32 1.442695, %v874_v62  ;;  %v3483_v17 = vpop.f32.mrb[76].mxu1  ;;  %1603 = vmax.xlane.f32.xlu0 %v1602_v2 }
 0x333   : > { %v3485_v16 = vpop.f32.mrb[77].mxu1  ;;  %v783_v6 = vpop.xlane.xlu0 %782 }
 0x334   : > { %4045 = vst [vmem:[#allocation36_spill] sm:$0xff] %v3485_v16  ;;  %2437 = vpow2.f32 %v939_v59  ;;  %v1605_v50 = vmax.f32 %v3483_v17, %v3485_v16  ;;  %v875_v24 = vsub.f32 %v3245_v22, %v783_v6  ;;  %v876_v19 = vsub.f32 %v3247_v23, %v783_v6 }
 0x335   : > { %2439 = vpow2.f32 %v941_v54 }
 0x336   : > { %2441 = vpow2.f32 %v937_v15  ;;  %v3491_v20 = vpop.f32.mrb[78].mxu1  ;;  %1606 = vmax.xlane.f32.xlu0 %v1605_v50  ;;  %v943_v62 = vmul.f32 1.442695, %v875_v24  ;;  %v945_v2 = vmul.f32 1.442695, %v876_v19  ;;  %v220_v24 = vld [vmem:[#allocation7 + $0x10] sm:$0xff] }
 0x337   : > { %v3493_v12 = vpop.f32.mrb[79].mxu1  ;;  %v786_v57 = vpop.xlane.xlu0 %785 }
 0x338   : > { %4046 = vst [vmem:[#allocation37_spill] sm:$0xff] %v3493_v12  ;;  %v1608_v9 = vmax.f32 %v3491_v20, %v3493_v12  ;;  %v877_v59 = vsub.f32 %v3253_v26, %v786_v57  ;;  %v878_v43 = vsub.f32 %v3255_v27, %v786_v57  ;;  %2443 = vpow2.f32 %v943_v62 }
 0x33a   : > { %v947_v22 = vmul.f32 1.442695, %v877_v59  ;;  %v949_v54 = vmul.f32 1.442695, %v878_v43  ;;  %v3499_v16 = vpop.f32.mrb[80].mxu1  ;;  %1609 = vmax.xlane.f32.xlu0 %v1608_v9  ;;  %v2436_v26 = vpop.eup %2435 }
 0x33b   : > { %4047 = vst [vmem:[#allocation38_spill] sm:$0xff] %v3499_v16  ;;  %v3501_v23 = vpop.f32.mrb[81].mxu1  ;;  %v789_v15 = vpop.xlane.xlu0 %788 }
 0x33c   : > { %4048 = vst [vmem:[#allocation39_spill] sm:$0xff] %v3501_v23  ;;  %2445 = vpow2.f32 %v947_v22  ;;  %v1611_v6 = vmax.f32 %v3499_v16, %v3501_v23  ;;  %v879_v50 = vsub.f32 %v3261_v30, %v789_v15  ;;  %v880_v27 = vsub.f32 %v3263_v31, %v789_v15  ;;  %v3515_v15 = vpop.f32.mrb[4].mxu0 }
 0x33d   : > { %2447 = vpow2.f32 %v949_v54 }
 0x33e   : > { %v2438_v19 = vpop.eup %2437  ;;  %2449 = vpow2.f32 %v945_v2  ;;  %v3507_v57 = vpop.f32.mrb[82].mxu1  ;;  %1612 = vmax.xlane.f32.xlu0 %v1611_v6  ;;  %v951_v9 = vmul.f32 1.442695, %v879_v50  ;;  %v953_v2 = vmul.f32 1.442695, %v880_v27 }
 0x33f   : > { %v2440_v62 = vpop.eup %2439  ;;  %240 = vperm.xlu1 %2434, %v220_v24   ;;  %v3509_v59 = vpop.f32.mrb[83].mxu1  ;;  %v2235_v22 = vpack.c.bf16 %v2438_v19, %v2436_v26 }
 0x340   : > { %4049 = vst [vmem:[#allocation40_spill] sm:$0xff] %v3509_v59  ;;  %v792_v43 = vpop.xlane.xlu0 %791  ;;  %v2442_v23 = vpop.eup %2441  ;;  %v1614_v30 = vmax.f32 %v3507_v57, %v3509_v59  ;;  %2451 = vpow2.f32 %v951_v9 }
 0x341   : > { %v881_v54 = vsub.f32 %v3269_v33, %v792_v43  ;;  %v882_v31 = vsub.f32 %v3271_v34, %v792_v43  ;;  %v2233_v16 = vpack.c.bf16 %v2440_v62, %v2442_v23  ;;  %v3517_v6 = vpop.f32.mrb[5].mxu0 }
 0x342   : > { %v3519_v12 = vpop.f32.mrb[84].mxu1  ;;  %1615 = vmax.xlane.f32.xlu0 %v1614_v30  ;;  %v2444_v23 = vpop.eup %2443 }
 0x343   : > { %v955_v50 = vmul.f32 1.442695, %v881_v54  ;;  %v957_v24 = vmul.f32 1.442695, %v882_v31  ;;  %2234 = vmatprep.subr.bf16.mxu0 %v2233_v16  ;;  %v3521_v26 = vpop.f32.mrb[85].mxu1 }
 0x344   : > { %v795_v19 = vpop.xlane.xlu0 %794  ;;  %2236 = vmatpush1.bf16.xpose.msra.mxu0 %v2235_v22 }
 0x345   : > { %2453 = vpow2.f32 %v955_v50  ;;  %v883_v34 = vsub.f32 %v3277_v37, %v795_v19  ;;  %v884_v27 = vsub.f32 %v3279_v38, %v795_v19 }
 0x346   : > { %2455 = vpow2.f32 %v957_v24  ;;  %v2446_v62 = vpop.eup %2445  ;;  %v3527_v43 = vpop.f32.mrb[86].mxu1 }
 0x347   : > { %2457 = vpow2.f32 %v953_v2  ;;  %v2448_v9 = vpop.eup %2447  ;;  %v959_v16 = vmul.f32 1.442695, %v883_v34  ;;  %v3529_v30 = vpop.f32.mrb[87].mxu1  ;;  %v2239_v31 = vpack.c.bf16 %v2446_v62, %v2444_v23  ;;  %v961_v33 = vmul.f32 1.442695, %v884_v27 }
 0x348   : > { %4050 = vst [vmem:[#allocation41_spill] sm:$0xff] %v3529_v30  ;;  %v798_v54 = vpop.xlane.xlu0 %797  ;;  %v2450_v22 = vpop.eup %2449  ;;  %v1620_v50 = vmax.f32 %v3527_v43, %v3529_v30 }
 0x349   : > { %v885_v37 = vsub.f32 %v3285_v41, %v798_v54  ;;  %v886_v24 = vsub.f32 %v3287_v42, %v798_v54  ;;  %v2237_v38 = vpack.c.bf16 %v2448_v9, %v2450_v22  ;;  %2459 = vpow2.f32 %v959_v16 }
 0x34a   : > { %v3535_v59 = vpop.f32.mrb[88].mxu1  ;;  %1621 = vmax.xlane.f32.xlu0 %v1620_v50  ;;  %v2452_v42 = vpop.eup %2451 }
 0x34b   : > { %v963_v19 = vmul.f32 1.442695, %v885_v37  ;;  %v965_v2 = vmul.f32 1.442695, %v886_v24  ;;  %2238 = vmatprep.subr.bf16.mxu0 %v2237_v38  ;;  %v3537_v34 = vpop.f32.mrb[89].mxu1 }
 0x34c   : > { %v801_v23 = vpop.xlane.xlu0 %800  ;;  %2240 = vmatpush1.bf16.xpose.msra.mxu0 %v2239_v31  ;;  %v1623_v62 = vmax.f32 %v3535_v59, %v3537_v34 }
 0x34d   : > { %2461 = vpow2.f32 %v963_v19  ;;  %v887_v41 = vsub.f32 %v3293_v44, %v801_v23  ;;  %v888_v27 = vsub.f32 %v3295_v45, %v801_v23 }
 0x34e   : > { %2463 = vpow2.f32 %v965_v2  ;;  %v3543_v54 = vpop.f32.mrb[90].mxu1  ;;  %1624 = vmax.xlane.f32.xlu0 %v1623_v62 }
 0x34f   : > { %v2454_v9 = vpop.eup %2453  ;;  %2465 = vpow2.f32 %v961_v33  ;;  %v967_v22 = vmul.f32 1.442695, %v887_v41  ;;  %v3545_v50 = vpop.f32.mrb[91].mxu1  ;;  %v969_v45 = vmul.f32 1.442695, %v888_v27 }
 0x350   : > { %v2456_v16 = vpop.eup %2455  ;;  %v804_v37 = vpop.xlane.xlu0 %803  ;;  %v2243_v31 = vpack.c.bf16 %v2454_v9, %v2452_v42  ;;  %v1626_v38 = vmax.f32 %v3543_v54, %v3545_v50 }
 0x351   : > { %v2458_v24 = vpop.eup %2457  ;;  %v889_v44 = vsub.f32 %v3301_v48, %v804_v37  ;;  %v890_v19 = vsub.f32 %v3303_v49, %v804_v37  ;;  %2467 = vpow2.f32 %v967_v22 }
 0x352   : > { %v2241_v2 = vpack.c.bf16 %v2456_v16, %v2458_v24  ;;  %v3551_v30 = vpop.f32.mrb[92].mxu1  ;;  %1627 = vmax.xlane.f32.xlu0 %v1626_v38 }
 0x353   : > { %v971_v33 = vmul.f32 1.442695, %v889_v44  ;;  %v973_v23 = vmul.f32 1.442695, %v890_v19  ;;  %v3553_v62 = vpop.f32.mrb[93].mxu1  ;;  %v807_v41 = vpop.xlane.xlu1 %806 }
 0x354   : > { %2242 = vmatprep.subr.bf16.mxu0 %v2241_v2  ;;  %v1629_v42 = vmax.f32 %v3551_v30, %v3553_v62  ;;  %v891_v48 = vsub.f32 %v3309_v52, %v807_v41  ;;  %v2460_v49 = vpop.eup %2459  ;;  %v892_v27 = vsub.f32 %v3311_v53, %v807_v41 }
 0x355   : > { %2469 = vpow2.f32 %v971_v33  ;;  %2244 = vmatpush1.bf16.xpose.msra.mxu0 %v2243_v31 }
 0x356   : > { %2471 = vpow2.f32 %v973_v23  ;;  %1630 = vmax.xlane.f32.xlu0 %v1629_v42  ;;  %v3559_v16 = vpop.f32.mrb[94].mxu1  ;;  %v975_v37 = vmul.f32 1.442695, %v891_v48  ;;  %v977_v53 = vmul.f32 1.442695, %v892_v27 }
 0x357   : > { %v2462_v9 = vpop.eup %2461  ;;  %2473 = vpow2.f32 %v969_v45  ;;  %v810_v24 = vpop.xlane.xlu0 %809 }
 0x358   : > { %v2464_v22 = vpop.eup %2463  ;;  %v3561_v38 = vpop.f32.mrb[95].mxu1  ;;  %v2247_v31 = vpack.c.bf16 %v2462_v9, %v2460_v49  ;;  %v893_v19 = vsub.f32 %v3316_v55, %v810_v24  ;;  %v894_v52 = vsub.f32 %v3318_v56, %v810_v24  ;;  %2475 = vpow2.f32 %v975_v37 }
 0x359   : > { %v2466_v44 = vpop.eup %2465  ;;  %v1632_v2 = vmax.f32 %v3559_v16, %v3561_v38 }
 0x35a   : > { %v2245_v33 = vpack.c.bf16 %v2464_v22, %v2466_v44  ;;  %v979_v45 = vmul.f32 1.442695, %v893_v19  ;;  %v981_v23 = vmul.f32 1.442695, %v894_v52  ;;  %v3567_v41 = vpop.f32.mrb[96].mxu1 }
 0x35b   : > { %1633 = vmax.xlane.f32.xlu0 %v1632_v2  ;;  %v3569_v42 = vpop.f32.mrb[97].mxu1  ;;  %v813_v48 = vpop.xlane.xlu1 %812 }
 0x35c   : > { %2246 = vmatprep.subr.bf16.mxu0 %v2245_v33  ;;  %2477 = vpow2.f32 %v979_v45  ;;  %v1635_v55 = vmax.f32 %v3567_v41, %v3569_v42  ;;  %v895_v56 = vsub.f32 %v3322_v0, %v813_v48  ;;  %v2468_v49 = vpop.eup %2467  ;;  %v896_v27 = vsub.f32 %v3324_v58, %v813_v48 }
 0x35d   : > { %2248 = vmatpush1.bf16.xpose.msra.mxu0 %v2247_v31  ;;  %2479 = vpow2.f32 %v981_v23 }
 0x35e   : > { %2481 = vpow2.f32 %v977_v53  ;;  %v3575_v22 = vpop.f32.mrb[98].mxu1  ;;  %v983_v24 = vmul.f32 1.442695, %v895_v56  ;;  %v985_v58 = vmul.f32 1.442695, %v896_v27 }
 0x35f   : > { %v2470_v9 = vpop.eup %2469  ;;  %1636 = vmax.xlane.f32.xlu0 %v1635_v55  ;;  %v816_v44 = vpop.xlane.xlu0 %815  ;;  %v4051_v55 = vmax.f32 %v3519_v12, %v3521_v26 }
 0x360   : > { %v2472_v37 = vpop.eup %2471  ;;  %v3577_v19 = vpop.f32.mrb[99].mxu1  ;;  %v2251_v31 = vpack.c.bf16 %v2470_v9, %v2468_v49  ;;  %v897_v2 = vsub.f32 %v3328_v60, %v816_v44  ;;  %v898_v0 = vsub.f32 %v3330_v61, %v816_v44  ;;  %2483 = vpow2.f32 %v983_v24 }
 0x361   : > { %v2474_v52 = vpop.eup %2473  ;;  %v1638_v33 = vmax.f32 %v3575_v22, %v3577_v19 }
 0x362   : > { %v2249_v45 = vpack.c.bf16 %v2472_v37, %v2474_v52  ;;  %v987_v53 = vmul.f32 1.442695, %v897_v2  ;;  %v989_v23 = vmul.f32 1.442695, %v898_v0  ;;  %v3583_v48 = vpop.f32.mrb[100].mxu1  ;;  %v2476_v27 = vpop.eup %2475 }
 0x363   : > { %1639 = vmax.xlane.f32.xlu0 %v1638_v33  ;;  %1618 = vmax.xlane.f32.xlu1 %v4051_v55  ;;  %v3588_v56 = vpop.f32.mrb[101].mxu1  ;;  %v819_v60 = vpop.xlane.xlu1 %818 }
 0x364   : > { %2250 = vmatprep.subr.bf16.mxu0 %v2249_v45  ;;  %2485 = vpow2.f32 %v987_v53  ;;  %v1641_v61 = vmax.f32 %v3583_v48, %v3588_v56  ;;  %v899_v49 = vsub.f32 %v3334_v63, %v819_v60  ;;  %v900_v9 = vsub.f32 %v3336_v1, %v819_v60 }
 0x365   : > { %2252 = vmatpush1.bf16.xpose.msra.mxu0 %v2251_v31  ;;  %2487 = vpow2.f32 %v989_v23 }
 0x366   : > { %v2478_v37 = vpop.eup %2477  ;;  %2489 = vpow2.f32 %v985_v58  ;;  %v3594_v24 = vpop.f32.mrb[102].mxu1  ;;  %v991_v52 = vmul.f32 1.442695, %v899_v49  ;;  %v993_v1 = vmul.f32 1.442695, %v900_v9 }
 0x367   : > { %1642 = vmax.xlane.f32.xlu0 %v1641_v61  ;;  %v2480_v44 = vpop.eup %2479  ;;  %v822_v2 = vpop.xlane.xlu0 %821  ;;  %v2255_v31 = vpack.c.bf16 %v2478_v37, %v2476_v27 }
 0x368   : > { %v3596_v0 = vpop.f32.mrb[103].mxu1  ;;  %v2482_v33 = vpop.eup %2481  ;;  %v901_v45 = vsub.f32 %v3341_v4, %v822_v2  ;;  %v902_v63 = vsub.f32 %v3343_v5, %v822_v2  ;;  %2491 = vpow2.f32 %v991_v52 }
 0x369   : > { %v1644_v53 = vmax.f32 %v3594_v24, %v3596_v0  ;;  %v2253_v23 = vpack.c.bf16 %v2480_v44, %v2482_v33 }
 0x36a   : > { %v995_v58 = vmul.f32 1.442695, %v901_v45  ;;  %v997_v55 = vmul.f32 1.442695, %v902_v63  ;;  %v3602_v60 = vpop.f32.mrb[104].mxu1  ;;  %v2484_v27 = vpop.eup %2483 }
 0x36b   : > { %1645 = vmax.xlane.f32.xlu0 %v1644_v53  ;;  %2254 = vmatprep.subr.bf16.mxu0 %v2253_v23  ;;  %v3604_v61 = vpop.f32.mrb[105].mxu1  ;;  %v825_v49 = vpop.xlane.xlu1 %824 }
 0x36c   : > { %2493 = vpow2.f32 %v995_v58  ;;  %v1647_v4 = vmax.f32 %v3602_v60, %v3604_v61  ;;  %v903_v5 = vsub.f32 %v3347_v7, %v825_v49  ;;  %v904_v9 = vsub.f32 %v3349_v8, %v825_v49 }
 0x36d   : > { %2256 = vmatpush1.bf16.xpose.msra.mxu0 %v2255_v31  ;;  %2495 = vpow2.f32 %v997_v55 }
 0x36e   : > { %v2486_v37 = vpop.eup %2485  ;;  %2497 = vpow2.f32 %v993_v1  ;;  %1648 = vmax.xlane.f32.xlu1 %v1647_v4  ;;  %v3610_v44 = vpop.f32.mrb[106].mxu1  ;;  %v999_v2 = vmul.f32 1.442695, %v903_v5  ;;  %v1001_v8 = vmul.f32 1.442695, %v904_v9 }
 0x36f   : > { %v2488_v52 = vpop.eup %2487  ;;  %v828_v33 = vpop.xlane.xlu0 %827  ;;  %v2259_v31 = vpack.c.bf16 %v2486_v37, %v2484_v27 }
 0x370   : > { %v3612_v45 = vpop.f32.mrb[107].mxu1  ;;  %v2490_v63 = vpop.eup %2489  ;;  %v905_v53 = vsub.f32 %v3353_v10, %v828_v33  ;;  %v906_v7 = vsub.f32 %v3355_v11, %v828_v33  ;;  %2499 = vpow2.f32 %v999_v2 }
 0x371   : > { %v1650_v23 = vmax.f32 %v3610_v44, %v3612_v45  ;;  %v2257_v58 = vpack.c.bf16 %v2488_v52, %v2490_v63 }
 0x372   : > { %v1003_v1 = vmul.f32 1.442695, %v905_v53  ;;  %v1005_v55 = vmul.f32 1.442695, %v906_v7  ;;  %v3618_v49 = vpop.f32.mrb[108].mxu1  ;;  %v2492_v27 = vpop.eup %2491 }
 0x373   : > { %1651 = vmax.xlane.f32.xlu0 %v1650_v23  ;;  %2258 = vmatprep.subr.bf16.mxu0 %v2257_v58  ;;  %v3620_v4 = vpop.f32.mrb[109].mxu1  ;;  %v831_v5 = vpop.xlane.xlu1 %830 }
 0x374   : > { %2501 = vpow2.f32 %v1003_v1  ;;  %v1653_v10 = vmax.f32 %v3618_v49, %v3620_v4  ;;  %v907_v11 = vsub.f32 %v3359_v13, %v831_v5  ;;  %v908_v9 = vsub.f32 %v3361_v14, %v831_v5 }
 0x375   : > { %2260 = vmatpush1.bf16.xpose.msra.mxu0 %v2259_v31  ;;  %2503 = vpow2.f32 %v1005_v55 }
 0x376   : > { %v2494_v37 = vpop.eup %2493  ;;  %2505 = vpow2.f32 %v1001_v8  ;;  %1654 = vmax.xlane.f32.xlu1 %v1653_v10  ;;  %v3626_v52 = vpop.f32.mrb[110].mxu1  ;;  %v1007_v33 = vmul.f32 1.442695, %v907_v11  ;;  %v1009_v14 = vmul.f32 1.442695, %v908_v9 }
 0x377   : > { %v2496_v2 = vpop.eup %2495  ;;  %v834_v63 = vpop.xlane.xlu0 %833  ;;  %v2263_v31 = vpack.c.bf16 %v2494_v37, %v2492_v27 }
 0x378   : > { %v3628_v53 = vpop.f32.mrb[111].mxu1  ;;  %v2498_v7 = vpop.eup %2497  ;;  %v909_v23 = vsub.f32 %v3365_v18, %v834_v63  ;;  %v910_v13 = vsub.f32 %v3367_v21, %v834_v63  ;;  %2507 = vpow2.f32 %v1007_v33 }
 0x379   : > { %v1656_v58 = vmax.f32 %v3626_v52, %v3628_v53  ;;  %v2261_v1 = vpack.c.bf16 %v2496_v2, %v2498_v7 }
 0x37a   : > { %v1011_v8 = vmul.f32 1.442695, %v909_v23  ;;  %v1013_v55 = vmul.f32 1.442695, %v910_v13  ;;  %v3634_v5 = vpop.f32.mrb[112].mxu1  ;;  %v2500_v27 = vpop.eup %2499 }
 0x37b   : > { %1657 = vmax.xlane.f32.xlu0 %v1656_v58  ;;  %2262 = vmatprep.subr.bf16.mxu0 %v2261_v1  ;;  %v3636_v10 = vpop.f32.mrb[113].mxu1  ;;  %v837_v11 = vpop.xlane.xlu1 %836 }
 0x37c   : > { %2509 = vpow2.f32 %v1011_v8  ;;  %v1659_v18 = vmax.f32 %v3634_v5, %v3636_v10  ;;  %v911_v21 = vsub.f32 %v3371_v25, %v837_v11  ;;  %v912_v9 = vsub.f32 %v3373_v28, %v837_v11 }
 0x37d   : > { %2264 = vmatpush1.bf16.xpose.msra.mxu0 %v2263_v31  ;;  %2511 = vpow2.f32 %v1013_v55 }
 0x37e   : > { %v2502_v37 = vpop.eup %2501  ;;  %2513 = vpow2.f32 %v1009_v14  ;;  %1660 = vmax.xlane.f32.xlu1 %v1659_v18  ;;  %v3642_v2 = vpop.f32.mrb[114].mxu1  ;;  %v1015_v63 = vmul.f32 1.442695, %v911_v21  ;;  %v1017_v28 = vmul.f32 1.442695, %v912_v9 }
 0x37f   : > { %v2504_v33 = vpop.eup %2503  ;;  %v840_v7 = vpop.xlane.xlu0 %839  ;;  %v2267_v31 = vpack.c.bf16 %v2502_v37, %v2500_v27 }
 0x380   : > { %v3644_v23 = vpop.f32.mrb[115].mxu1  ;;  %v2506_v13 = vpop.eup %2505  ;;  %v913_v58 = vsub.f32 %v3377_v32, %v840_v7  ;;  %v914_v25 = vsub.f32 %v3379_v35, %v840_v7  ;;  %2515 = vpow2.f32 %v1015_v63 }
 0x381   : > { %v1662_v1 = vmax.f32 %v3642_v2, %v3644_v23  ;;  %v2265_v8 = vpack.c.bf16 %v2504_v33, %v2506_v13 }
 0x382   : > { %v1019_v14 = vmul.f32 1.442695, %v913_v58  ;;  %v1021_v55 = vmul.f32 1.442695, %v914_v25  ;;  %v3650_v11 = vpop.f32.mrb[116].mxu1  ;;  %v2508_v27 = vpop.eup %2507 }
 0x383   : > { %1663 = vmax.xlane.f32.xlu0 %v1662_v1  ;;  %2266 = vmatprep.subr.bf16.mxu0 %v2265_v8  ;;  %v3652_v18 = vpop.f32.mrb[117].mxu1  ;;  %v843_v21 = vpop.xlane.xlu1 %842 }
 0x384   : > { %2517 = vpow2.f32 %v1019_v14  ;;  %v1665_v32 = vmax.f32 %v3650_v11, %v3652_v18  ;;  %v915_v35 = vsub.f32 %v3383_v39, %v843_v21  ;;  %v916_v9 = vsub.f32 %v3385_v40, %v843_v21 }
 0x385   : > { %2268 = vmatpush1.bf16.xpose.msra.mxu0 %v2267_v31  ;;  %2519 = vpow2.f32 %v1021_v55 }
 0x386   : > { %v2510_v37 = vpop.eup %2509  ;;  %2521 = vpow2.f32 %v1017_v28  ;;  %1666 = vmax.xlane.f32.xlu1 %v1665_v32  ;;  %v3658_v33 = vpop.f32.mrb[118].mxu1  ;;  %v1023_v7 = vmul.f32 1.442695, %v915_v35  ;;  %v1025_v40 = vmul.f32 1.442695, %v916_v9 }
 0x387   : > { %4052 = vst [vmem:[#allocation42_spill] sm:$0xff] %v3658_v33  ;;  %v2512_v63 = vpop.eup %2511  ;;  %v846_v13 = vpop.xlane.xlu0 %845  ;;  %v2271_v31 = vpack.c.bf16 %v2510_v37, %v2508_v27  ;;  %v4056_v27 = vld [vmem:[#allocation12_spill] sm:$0xff] }
 0x388   : > { %v3660_v58 = vpop.f32.mrb[119].mxu1  ;;  %v2514_v25 = vpop.eup %2513  ;;  %v917_v1 = vsub.f32 %v3389_v46, %v846_v13  ;;  %v918_v39 = vsub.f32 %v3391_v47, %v846_v13  ;;  %2523 = vpow2.f32 %v1023_v7 }
 0x389   : > { %4053 = vst [vmem:[#allocation43_spill] sm:$0xff] %v3660_v58  ;;  %v1668_v8 = vmax.f32 %v3658_v33, %v3660_v58  ;;  %v2269_v14 = vpack.c.bf16 %v2512_v63, %v2514_v25 }
 0x38a   : > { %v1027_v28 = vmul.f32 1.442695, %v917_v1  ;;  %v1029_v55 = vmul.f32 1.442695, %v918_v39  ;;  %v3666_v21 = vpop.f32.mrb[120].mxu1  ;;  %v2516_v37 = vpop.eup %2515 }
 0x38b   : > { %1669 = vmax.xlane.f32.xlu0 %v1668_v8  ;;  %4054 = vst [vmem:[#allocation44_spill] sm:$0xff] %v3666_v21  ;;  %2270 = vmatprep.subr.bf16.mxu0 %v2269_v14  ;;  %v3668_v32 = vpop.f32.mrb[121].mxu1  ;;  %v849_v35 = vpop.xlane.xlu1 %848 }
 0x38c   : > { %4055 = vst [vmem:[#allocation45_spill] sm:$0xff] %v3668_v32  ;;  %2525 = vpow2.f32 %v1027_v28  ;;  %v1671_v46 = vmax.f32 %v3666_v21, %v3668_v32  ;;  %v919_v47 = vsub.f32 %v3395_v51, %v849_v35  ;;  %v920_v9 = vsub.f32 %v4056_v27, %v849_v35  ;;  %v4059_v28 = vld [vmem:[#allocation13_spill] sm:$0xff]  ;;  %v4060_v51 = vld [vmem:[#allocation14_spill] sm:$0xff] }
 0x38d   : > { %2272 = vmatpush1.bf16.xpose.msra.mxu0 %v2271_v31  ;;  %2527 = vpow2.f32 %v1029_v55 }
 0x38e   : > { %v2518_v63 = vpop.eup %2517  ;;  %2529 = vpow2.f32 %v1025_v40  ;;  %v1031_v13 = vmul.f32 1.442695, %v919_v47  ;;  %1672 = vmax.xlane.f32.xlu1 %v1671_v46  ;;  %v3674_v7 = vpop.f32.mrb[122].mxu1  ;;  %v1033_v1 = vmul.f32 1.442695, %v920_v9 }
 0x38f   : > { %4057 = vst [vmem:[#allocation12_spill] sm:$0xff] %v3674_v7  ;;  %v2520_v25 = vpop.eup %2519  ;;  %v852_v39 = vpop.xlane.xlu0 %851  ;;  %v2275_v31 = vpack.c.bf16 %v2518_v63, %v2516_v37  ;;  %v4063_v63 = vld [vmem:[#allocation15_spill] sm:$0xff] }
 0x390   : > { %v3676_v8 = vpop.f32.mrb[123].mxu1  ;;  %v2522_v14 = vpop.eup %2521  ;;  %v921_v32 = vsub.f32 %v4059_v28, %v852_v39  ;;  %v922_v21 = vsub.f32 %v4060_v51, %v852_v39  ;;  %2531 = vpow2.f32 %v1031_v13  ;;  %v4064_v28 = vld [vmem:[#allocation16_spill] sm:$0xff] }
 0x391   : > { %4058 = vst [vmem:[#allocation46_spill] sm:$0xff] %v3676_v8  ;;  %v1674_v55 = vmax.f32 %v3674_v7, %v3676_v8  ;;  %v2273_v35 = vpack.c.bf16 %v2520_v25, %v2522_v14  ;;  %2533 = vpow2.f32 %v1033_v1  ;;  %v4067_v8 = vld [vmem:[#allocation17_spill] sm:$0xff]  ;;  %v4070_v7 = vld [vmem:[#allocation20_spill] sm:$0xff] }
 0x392   : > { %v1035_v40 = vmul.f32 1.442695, %v921_v32  ;;  %v1037_v46 = vmul.f32 1.442695, %v922_v21  ;;  %v3682_v47 = vpop.f32.mrb[124].mxu1  ;;  %v2524_v13 = vpop.eup %2523 }
 0x393   : > { %1675 = vmax.xlane.f32.xlu0 %v1674_v55  ;;  %4061 = vst [vmem:[#allocation13_spill] sm:$0xff] %v3682_v47  ;;  %2274 = vmatprep.subr.bf16.mxu0 %v2273_v35  ;;  %v3684_v27 = vpop.f32.mrb[125].mxu1  ;;  %v855_v9 = vpop.xlane.xlu1 %854 }
 0x394   : > { %4062 = vst [vmem:[#allocation14_spill] sm:$0xff] %v3684_v27  ;;  %2535 = vpow2.f32 %v1035_v40  ;;  %v1677_v37 = vmax.f32 %v3682_v47, %v3684_v27  ;;  %v923_v39 = vsub.f32 %v4063_v63, %v855_v9  ;;  %v924_v25 = vsub.f32 %v4064_v28, %v855_v9  ;;  %v4068_v47 = vld [vmem:[#allocation18_spill] sm:$0xff] }
 0x395   : > { %2276 = vmatpush1.bf16.xpose.msra.mxu0 %v2275_v31  ;;  %2537 = vpow2.f32 %v1037_v46 }
 0x396   : > { %v2526_v21 = vpop.eup %2525  ;;  %v1039_v32 = vmul.f32 1.442695, %v923_v39  ;;  %1678 = vmax.xlane.f32.xlu1 %v1677_v37  ;;  %v3690_v14 = vpop.f32.mrb[126].mxu1  ;;  %v1041_v51 = vmul.f32 1.442695, %v924_v25 }
 0x397   : > { %4065 = vst [vmem:[#allocation15_spill] sm:$0xff] %v3690_v14  ;;  %v2528_v1 = vpop.eup %2527  ;;  %v858_v55 = vpop.xlane.xlu0 %857  ;;  %v2279_v31 = vpack.c.bf16 %v2526_v21, %v2524_v13  ;;  %v4069_v13 = vld [vmem:[#allocation19_spill] sm:$0xff] }
 0x398   : > { %v3692_v35 = vpop.f32.mrb[127].mxu1  ;;  %v2530_v40 = vpop.eup %2529  ;;  %v925_v27 = vsub.f32 %v4067_v8, %v858_v55  ;;  %v926_v63 = vsub.f32 %v4068_v47, %v858_v55  ;;  %2539 = vpow2.f32 %v1039_v32 }
 0x399   : > { %4066 = vst [vmem:[#allocation16_spill] sm:$0xff] %v3692_v35  ;;  %v1680_v9 = vmax.f32 %v3690_v14, %v3692_v35  ;;  %v2277_v46 = vpack.c.bf16 %v2528_v1, %v2530_v40  ;;  %2541 = vpow2.f32 %v1041_v51  ;;  %v4071_v40 = vld [vmem:[#allocation21_spill] sm:$0xff]  ;;  %v4072_v51 = vld [vmem:[#allocation22_spill] sm:$0xff] }
 0x39a   : > { %v1043_v39 = vmul.f32 1.442695, %v925_v27  ;;  %v1045_v37 = vmul.f32 1.442695, %v926_v63  ;;  %v2532_v25 = vpop.eup %2531  ;;  %v221_v14 = vld [vmem:[#allocation7 + $0x18] sm:$0xff] }
 0x39b   : > { %1681 = vmax.xlane.f32.xlu0 %v1680_v9  ;;  %2278 = vmatprep.subr.bf16.mxu0 %v2277_v46  ;;  %v861_v28 = vpop.xlane.xlu1 %860  ;;  %v2534_v58 = vpop.eup %2533 }
 0x39c   : > { %2543 = vpow2.f32 %v1043_v39  ;;  %v927_v21 = vsub.f32 %v4069_v13, %v861_v28  ;;  %v928_v8 = vsub.f32 %v4070_v7, %v861_v28 }
 0x39d   : > { %2280 = vmatpush1.bf16.xpose.msra.mxu0 %v2279_v31  ;;  %2545 = vpow2.f32 %v1045_v37  ;;  %v4073_v37 = vld [vmem:[#allocation23_spill] sm:$0xff] }
 0x39e   : > { %v2536_v47 = vpop.eup %2535  ;;  %v1047_v55 = vmul.f32 1.442695, %v927_v21  ;;  %v1049_v1 = vmul.f32 1.442695, %v928_v8  ;;  %v4074_v21 = vld [vmem:[#allocation24_spill] sm:$0xff] }
 0x39f   : > { %v2538_v35 = vpop.eup %2537  ;;  %v864_v32 = vpop.xlane.xlu0 %863  ;;  %v2283_v27 = vpack.c.bf16 %v2536_v47, %v2532_v25 }
 0x3a0   : > { %v929_v63 = vsub.f32 %v4071_v40, %v864_v32  ;;  %v930_v9 = vsub.f32 %v4072_v51, %v864_v32  ;;  %v2281_v46 = vpack.c.bf16 %v2538_v35, %v2534_v58  ;;  %2547 = vpow2.f32 %v1047_v55  ;;  %v4076_v51 = vld [vmem:[#allocation26_spill] sm:$0xff] }
 0x3a1   : > { %2549 = vpow2.f32 %v1049_v1 }
 0x3a2   : > { %v1051_v39 = vmul.f32 1.442695, %v929_v63  ;;  %v1053_v31 = vmul.f32 1.442695, %v930_v9  ;;  %2282 = vmatprep.subr.bf16.mxu0 %v2281_v46  ;;  %v2540_v7 = vpop.eup %2539  ;;  %v4075_v63 = vld [vmem:[#allocation25_spill] sm:$0xff] }
 0x3a3   : > { %v867_v13 = vpop.xlane.xlu1 %866  ;;  %v2542_v25 = vpop.eup %2541 }
 0x3a4   : > { %2551 = vpow2.f32 %v1051_v39  ;;  %v931_v28 = vsub.f32 %v4073_v37, %v867_v13  ;;  %v932_v8 = vsub.f32 %v4074_v21, %v867_v13  ;;  %v3706_v39 = vpop.f32.mrb[6].mxu0 }
 0x3a5   : > { %2284 = vmatpush1.bf16.xpose.msra.mxu0 %v2283_v27  ;;  %2553 = vpow2.f32 %v1053_v31  ;;  %v222_v27 = vld [vmem:[#allocation7 + $0x20] sm:$0xff]  ;;  %4077 = vst [vmem:[#allocation17_spill] sm:$0xff] %v3706_v39  ;;  %v3708_v37 = vpop.f32.mrb[7].mxu0 }
 0x3a6   : > { %v2544_v47 = vpop.eup %2543  ;;  %v1055_v40 = vmul.f32 1.442695, %v931_v28  ;;  %v1057_v58 = vmul.f32 1.442695, %v932_v8  ;;  %4078 = vst [vmem:[#allocation18_spill] sm:$0xff] %v3708_v37 }
 0x3a7   : > { %v2546_v32 = vpop.eup %2545  ;;  %v870_v35 = vpop.xlane.xlu0 %869  ;;  %245 = vperm.xlu1 %2434, %v221_v14   ;;  %v2287_v55 = vpack.c.bf16 %v2544_v47, %v2540_v7  ;;  %v4079_v14 = vld [vmem:[#allocation27_spill] sm:$0xff]  ;;  %v4080_v47 = vld [vmem:[#allocation28_spill] sm:$0xff] }
 0x3a8   : > { %v933_v1 = vsub.f32 %v4075_v63, %v870_v35  ;;  %v934_v9 = vsub.f32 %v4076_v51, %v870_v35  ;;  %v2285_v46 = vpack.c.bf16 %v2546_v32, %v2542_v25  ;;  %2555 = vpow2.f32 %v1055_v40 }
 0x3a9   : > { %2557 = vpow2.f32 %v1057_v58 }
 0x3aa   : > { %v1059_v13 = vmul.f32 1.442695, %v933_v1  ;;  %v1061_v31 = vmul.f32 1.442695, %v934_v9  ;;  %2286 = vmatprep.subr.bf16.mxu0 %v2285_v46  ;;  %v2548_v21 = vpop.eup %2547  ;;  %v4081_v1 = vld [vmem:[#allocation29_spill] sm:$0xff]  ;;  %v4082_v46 = vld [vmem:[#allocation30_spill] sm:$0xff] }
 0x3ab   : > { %1188 = vperm.xlu1 %2434, %v222_v27   ;;  %v1589_v28 = vpop.xlane.xlu1 %1588  ;;  %v2550_v8 = vpop.eup %2549 }
 0x3ac   : > { %2559 = vpow2.f32 %v1059_v13  ;;  %v1683_v7 = vsub.f32 %v4079_v14, %v1589_v28  ;;  %v1684_v32 = vsub.f32 %v4080_v47, %v1589_v28  ;;  %v4084_v47 = vld [vmem:[#allocation32_spill] sm:$0xff] }
 0x3ad   : > { %2288 = vmatpush1.bf16.xpose.msra.mxu0 %v2287_v55  ;;  %2561 = vpow2.f32 %v1061_v31  ;;  %v4083_v31 = vld [vmem:[#allocation31_spill] sm:$0xff] }
 0x3ae   : > { %v2552_v25 = vpop.eup %2551  ;;  %v1747_v63 = vmul.f32 1.442695, %v1683_v7  ;;  %v1749_v37 = vmul.f32 1.442695, %v1684_v32 }
 0x3af   : > { %v2554_v35 = vpop.eup %2553  ;;  %v1592_v51 = vpop.xlane.xlu0 %1591  ;;  %v2291_v40 = vpack.c.bf16 %v2552_v25, %v2548_v21 }
 0x3b0   : > { %v1685_v9 = vsub.f32 %v4081_v1, %v1592_v51  ;;  %v1686_v58 = vsub.f32 %v4082_v46, %v1592_v51  ;;  %v2289_v27 = vpack.c.bf16 %v2554_v35, %v2550_v8  ;;  %2563 = vpow2.f32 %v1747_v63  ;;  %v4085_v1 = vld [vmem:[#allocation33_spill] sm:$0xff]  ;;  %v4086_v63 = vld [vmem:[#allocation34_spill] sm:$0xff] }
 0x3b2   : > { %v1751_v39 = vmul.f32 1.442695, %v1685_v9  ;;  %v1753_v13 = vmul.f32 1.442695, %v1686_v58  ;;  %2290 = vmatprep.subr.bf16.mxu0 %v2289_v27  ;;  %v2556_v14 = vpop.eup %2555 }
 0x3b3   : > { %v1595_v55 = vpop.xlane.xlu1 %1594  ;;  %v2558_v33 = vpop.eup %2557 }
 0x3b4   : > { %2565 = vpow2.f32 %v1751_v39  ;;  %v1687_v28 = vsub.f32 %v4083_v31, %v1595_v55  ;;  %v1688_v7 = vsub.f32 %v4084_v47, %v1595_v55 }
 0x3b5   : > { %2292 = vmatpush1.bf16.xpose.msra.mxu0 %v2291_v40  ;;  %2567 = vpow2.f32 %v1753_v13  ;;  %v4087_v13 = vld [vmem:[#allocation35_spill] sm:$0xff] }
 0x3b6   : > { %v2560_v21 = vpop.eup %2559  ;;  %2569 = vpow2.f32 %v1749_v37  ;;  %v1755_v25 = vmul.f32 1.442695, %v1687_v28  ;;  %v1757_v8 = vmul.f32 1.442695, %v1688_v7 }
 0x3b7   : > { %v2562_v51 = vpop.eup %2561  ;;  %v1598_v32 = vpop.xlane.xlu0 %1597  ;;  %v2295_v35 = vpack.c.bf16 %v2560_v21, %v2556_v14 }
 0x3b8   : > { %v1689_v9 = vsub.f32 %v4085_v1, %v1598_v32  ;;  %v1690_v46 = vsub.f32 %v4086_v63, %v1598_v32  ;;  %v2293_v58 = vpack.c.bf16 %v2562_v51, %v2558_v33  ;;  %2571 = vpow2.f32 %v1755_v25 }
 0x3b9   : > { %2573 = vpow2.f32 %v1757_v8 }
 0x3ba   : > { %v1759_v39 = vmul.f32 1.442695, %v1689_v9  ;;  %v1761_v40 = vmul.f32 1.442695, %v1690_v46  ;;  %2294 = vmatprep.subr.bf16.mxu0 %v2293_v58  ;;  %v2564_v31 = vpop.eup %2563 }
 0x3bb   : > { %v1601_v27 = vpop.xlane.xlu1 %1600 }
 0x3bc   : > { %2575 = vpow2.f32 %v1759_v39  ;;  %v1691_v37 = vsub.f32 %v3467_v29, %v1601_v27  ;;  %v1692_v55 = vsub.f32 %v4087_v13, %v1601_v27 }
 0x3bd   : > { %2296 = vmatpush1.bf16.xpose.msra.mxu0 %v2295_v35  ;;  %2577 = vpow2.f32 %v1761_v40 }
 0x3be   : > { %v2566_v14 = vpop.eup %2565  ;;  %v1763_v28 = vmul.f32 1.442695, %v1691_v37  ;;  %v1765_v7 = vmul.f32 1.442695, %v1692_v55 }
 0x3bf   : > { %v2568_v47 = vpop.eup %2567  ;;  %v1604_v21 = vpop.xlane.xlu0 %1603  ;;  %v2299_v25 = vpack.c.bf16 %v2566_v14, %v2564_v31  ;;  %v4089_v14 = vld [vmem:[#allocation37_spill] sm:$0xff] }
 0x3c0   : > { %v241_v33 = vpop.permute.xlu1 %240  ;;  %v2570_v51 = vpop.eup %2569  ;;  %v1693_v32 = vsub.f32 %v3475_v36, %v1604_v21  ;;  %v1694_v8 = vsub.f32 %v3477_v3, %v1604_v21  ;;  %2579 = vpow2.f32 %v1763_v28  ;;  %v4088_v3 = vld [vmem:[#allocation36_spill] sm:$0xff] }
 0x3c1   : > { %v3723_v35 = vadd.f32 %v3515_v15, %v241_v33  ;;  %v3726_v29 = vadd.f32 %v3517_v6, %v241_v33  ;;  %v2297_v1 = vpack.c.bf16 %v2568_v47, %v2570_v51  ;;  %2581 = vpow2.f32 %v1765_v7 }
 0x3c2   : > { %v1767_v9 = vmul.f32 1.442695, %v1693_v32  ;;  %v1769_v63 = vmul.f32 1.442695, %v1694_v8  ;;  %v2572_v58 = vpop.eup %2571  ;;  %v4091_v32 = vld [vmem:[#allocation39_spill] sm:$0xff] }
 0x3c3   : > { %2298 = vmatprep.subr.bf16.mxu0 %v2297_v1  ;;  %1127 = vmatprep.mubr.f32.mxu0 %v3726_v29  ;;  %v1607_v46 = vpop.xlane.xlu0 %1606  ;;  %v2574_v15 = vpop.eup %2573 }
 0x3c4   : > { %2583 = vpow2.f32 %v1767_v9  ;;  %v1695_v36 = vsub.f32 %v3483_v17, %v1607_v46  ;;  %v1696_v39 = vsub.f32 %v4088_v3, %v1607_v46  ;;  %1128 = vmatmul.mubr.f32.vlgmr.msra.gmra.mrb[8].mxu0 %v3723_v35 }
 0x3c5   : > { %2585 = vpow2.f32 %v1769_v63  ;;  %2300 = vmatpush1.bf16.xpose.msra.mxu0 %v2299_v25  ;;  %v4090_v25 = vld [vmem:[#allocation38_spill] sm:$0xff] }
 0x3c6   : > { %v2576_v6 = vpop.eup %2575  ;;  %v1771_v40 = vmul.f32 1.442695, %v1695_v36  ;;  %v1773_v37 = vmul.f32 1.442695, %v1696_v39  ;;  %v4092_v39 = vld [vmem:[#allocation40_spill] sm:$0xff] }
 0x3c7   : > { %v2578_v27 = vpop.eup %2577  ;;  %v1610_v13 = vpop.xlane.xlu0 %1609  ;;  %v2303_v55 = vpack.c.bf16 %v2576_v6, %v2572_v58 }
 0x3c8   : > { %v1697_v31 = vsub.f32 %v3491_v20, %v1610_v13  ;;  %v1698_v28 = vsub.f32 %v4089_v14, %v1610_v13  ;;  %v2301_v47 = vpack.c.bf16 %v2578_v27, %v2574_v15  ;;  %2587 = vpow2.f32 %v1771_v40 }
 0x3c9   : > { %2589 = vpow2.f32 %v1773_v37 }
 0x3ca   : > { %v1775_v17 = vmul.f32 1.442695, %v1697_v31  ;;  %v1777_v7 = vmul.f32 1.442695, %v1698_v28  ;;  %2302 = vmatprep.subr.bf16.mxu0 %v2301_v47  ;;  %v2580_v33 = vpop.eup %2579 }
 0x3cb   : > { %v1613_v21 = vpop.xlane.xlu0 %1612  ;;  %v2582_v1 = vpop.eup %2581 }
 0x3cc   : > { %2591 = vpow2.f32 %v1775_v17  ;;  %v1699_v51 = vsub.f32 %v4090_v25, %v1613_v21  ;;  %v1700_v8 = vsub.f32 %v4091_v32, %v1613_v21 }
 0x3cd   : > { %2593 = vpow2.f32 %v1777_v7  ;;  %2304 = vmatpush1.bf16.xpose.msra.mxu0 %v2303_v55 }
 0x3ce   : > { %v2584_v9 = vpop.eup %2583  ;;  %v1779_v20 = vmul.f32 1.442695, %v1699_v51  ;;  %v1781_v46 = vmul.f32 1.442695, %v1700_v8 }
 0x3cf   : > { %v2586_v63 = vpop.eup %2585  ;;  %v1616_v58 = vpop.xlane.xlu0 %1615  ;;  %v2307_v36 = vpack.c.bf16 %v2584_v9, %v2580_v33 }
 0x3d0   : > { %v1701_v3 = vsub.f32 %v3507_v57, %v1616_v58  ;;  %v1702_v15 = vsub.f32 %v4092_v39, %v1616_v58  ;;  %v2305_v6 = vpack.c.bf16 %v2586_v63, %v2582_v1  ;;  %2595 = vpow2.f32 %v1779_v20 }
 0x3d1   : > { %2597 = vpow2.f32 %v1781_v46 }
 0x3d2   : > { %v1783_v40 = vmul.f32 1.442695, %v1701_v3  ;;  %v1785_v27 = vmul.f32 1.442695, %v1702_v15  ;;  %2306 = vmatprep.subr.bf16.mxu0 %v2305_v6  ;;  %v2588_v37 = vpop.eup %2587 }
 0x3d3   : > { %v2590_v13 = vpop.eup %2589 }
 0x3d4   : > { %2599 = vpow2.f32 %v1783_v40 }
 0x3d5   : > { %2601 = vpow2.f32 %v1785_v27  ;;  %2308 = vmatpush1.bf16.xpose.msra.mxu0 %v2307_v36  ;;  %v4093_v27 = vld [vmem:[#allocation41_spill] sm:$0xff] }
 0x3d6   : > { %v2592_v55 = vpop.eup %2591 }
 0x3d7   : > { %v2594_v31 = vpop.eup %2593  ;;  %v1622_v14 = vpop.xlane.xlu0 %1621  ;;  %v2311_v28 = vpack.c.bf16 %v2592_v55, %v2588_v37 }
 0x3d8   : > { %v2309_v47 = vpack.c.bf16 %v2594_v31, %v2590_v13  ;;  %v1706_v37 = vsub.f32 %v4093_v27, %v1622_v14 }
 0x3da   : > { %2310 = vmatprep.subr.bf16.mxu0 %v2309_v47  ;;  %v2596_v17 = vpop.eup %2595 }
 0x3db   : > { %v1625_v57 = vpop.xlane.xlu0 %1624  ;;  %v2598_v33 = vpop.eup %2597 }
 0x3dc   : > { %v1707_v7 = vsub.f32 %v3535_v59, %v1625_v57  ;;  %v1708_v21 = vsub.f32 %v3537_v34, %v1625_v57 }
 0x3dd   : > { %2312 = vmatpush1.bf16.xpose.msra.mxu0 %v2311_v28 }
 0x3de   : > { %v2600_v25 = vpop.eup %2599  ;;  %v1795_v51 = vmul.f32 1.442695, %v1707_v7  ;;  %v1797_v8 = vmul.f32 1.442695, %v1708_v21 }
 0x3df   : > { %v2602_v32 = vpop.eup %2601  ;;  %v1628_v1 = vpop.xlane.xlu0 %1627  ;;  %v2315_v9 = vpack.c.bf16 %v2600_v25, %v2596_v17 }
 0x3e0   : > { %v1709_v20 = vsub.f32 %v3543_v54, %v1628_v1  ;;  %v1710_v63 = vsub.f32 %v3545_v50, %v1628_v1  ;;  %v2313_v46 = vpack.c.bf16 %v2602_v32, %v2598_v33  ;;  %2603 = vpow2.f32 %v1795_v51 }
 0x3e1   : > { %2605 = vpow2.f32 %v1797_v8  ;;  %v1705_v54 = vsub.f32 %v3527_v43, %v1622_v14 }
 0x3e2   : > { %v1799_v58 = vmul.f32 1.442695, %v1709_v20  ;;  %v1801_v36 = vmul.f32 1.442695, %v1710_v63  ;;  %2314 = vmatprep.subr.bf16.mxu0 %v2313_v46 }
 0x3e3   : > { %v1631_v59 = vpop.xlane.xlu0 %1630 }
 0x3e4   : > { %2607 = vpow2.f32 %v1799_v58  ;;  %v1711_v34 = vsub.f32 %v3551_v30, %v1631_v59  ;;  %v1712_v3 = vsub.f32 %v3553_v62, %v1631_v59  ;;  %v1791_v62 = vmul.f32 1.442695, %v1705_v54 }
 0x3e5   : > { %2609 = vpow2.f32 %v1801_v36  ;;  %2316 = vmatpush1.bf16.xpose.msra.mxu0 %v2315_v9 }
 0x3e6   : > { %v1803_v39 = vmul.f32 1.442695, %v1711_v34  ;;  %v1805_v15 = vmul.f32 1.442695, %v1712_v3 }
 0x3e8   : > { %v1634_v6 = vpop.xlane.xlu0 %1633  ;;  %2611 = vpow2.f32 %v1803_v39 }
 0x3e9   : > { %v1713_v50 = vsub.f32 %v3559_v16, %v1634_v6  ;;  %v1714_v40 = vsub.f32 %v3561_v38, %v1634_v6  ;;  %2613 = vpow2.f32 %v1805_v15  ;;  %v1793_v16 = vmul.f32 1.442695, %v1706_v37 }
 0x3ea   : > { %v3748_v31 = vpop.eup %2603 }
 0x3eb   : > { %v1807_v13 = vmul.f32 1.442695, %v1713_v50  ;;  %v1809_v55 = vmul.f32 1.442695, %v1714_v40  ;;  %v3752_v43 = vpop.eup %2605 }
 0x3ec   : > { %v1637_v30 = vpop.xlane.xlu0 %1636 }
 0x3ed   : > { %2615 = vpow2.f32 %v1807_v13  ;;  %v1715_v28 = vsub.f32 %v3567_v41, %v1637_v30  ;;  %v1716_v47 = vsub.f32 %v3569_v42, %v1637_v30 }
 0x3ee   : > { %2617 = vpow2.f32 %v1809_v55  ;;  %v3754_v38 = vpop.eup %2607 }
 0x3ef   : > { %v1811_v14 = vmul.f32 1.442695, %v1715_v28  ;;  %v3756_v57 = vpop.eup %2609  ;;  %v1813_v17 = vmul.f32 1.442695, %v1716_v47  ;;  %v2323_v21 = vpack.c.bf16 %v3754_v38, %v3748_v31  ;;  %2619 = vpow2.f32 %v1791_v62 }
 0x3f0   : > { %v1640_v7 = vpop.xlane.xlu0 %1639  ;;  %v1619_v42 = vpop.xlane.xlu1 %1618  ;;  %v2321_v25 = vpack.c.bf16 %v3756_v57, %v3752_v43  ;;  %2621 = vpow2.f32 %v1793_v16 }
 0x3f1   : > { %v1717_v33 = vsub.f32 %v3575_v22, %v1640_v7  ;;  %v1718_v41 = vsub.f32 %v3577_v19, %v1640_v7  ;;  %v1703_v51 = vsub.f32 %v3519_v12, %v1619_v42  ;;  %v1704_v32 = vsub.f32 %v3521_v26, %v1619_v42 }
 0x3f2   : > { %2623 = vpow2.f32 %v1811_v14  ;;  %v3766_v46 = vpop.eup %2611 }
 0x3f3   : > { %v1815_v8 = vmul.f32 1.442695, %v1717_v33  ;;  %v1817_v1 = vmul.f32 1.442695, %v1718_v41  ;;  %2625 = vpow2.f32 %v1813_v17  ;;  %v1787_v9 = vmul.f32 1.442695, %v1703_v51  ;;  %v3770_v58 = vpop.eup %2613 }
 0x3f4   : > { %v1789_v20 = vmul.f32 1.442695, %v1704_v32  ;;  %v1643_v63 = vpop.xlane.xlu0 %1642 }
 0x3f5   : > { %2627 = vpow2.f32 %v1815_v8  ;;  %v1719_v22 = vsub.f32 %v3583_v48, %v1643_v63  ;;  %v1720_v19 = vsub.f32 %v3588_v56, %v1643_v63 }
 0x3f6   : > { %2629 = vpow2.f32 %v1817_v1 }
 0x3f7   : > { %v3772_v12 = vpop.eup %2615  ;;  %2631 = vpow2.f32 %v1787_v9  ;;  %v1819_v26 = vmul.f32 1.442695, %v1719_v22  ;;  %v1821_v59 = vmul.f32 1.442695, %v1720_v19 }
 0x3f8   : > { %v3774_v36 = vpop.eup %2617  ;;  %2633 = vpow2.f32 %v1789_v20  ;;  %v1646_v34 = vpop.xlane.xlu0 %1645  ;;  %v2327_v3 = vpack.c.bf16 %v3772_v12, %v3766_v46 }
 0x3f9   : > { %v1721_v39 = vsub.f32 %v3594_v24, %v1646_v34  ;;  %v1722_v48 = vsub.f32 %v3596_v0, %v1646_v34  ;;  %v2325_v56 = vpack.c.bf16 %v3774_v36, %v3770_v58  ;;  %v2620_v15 = vpop.eup %2619  ;;  %2635 = vpow2.f32 %v1819_v26 }
 0x3fa   : > { %v2622_v50 = vpop.eup %2621  ;;  %2637 = vpow2.f32 %v1821_v59 }
 0x3fb   : > { %v1823_v6 = vmul.f32 1.442695, %v1721_v39  ;;  %v1825_v54 = vmul.f32 1.442695, %v1722_v48  ;;  %v1649_v40 = vpop.xlane.xlu1 %1648 }
 0x3fc   : > { %v3782_v27 = vpop.eup %2623  ;;  %v1723_v37 = vsub.f32 %v3602_v60, %v1649_v40  ;;  %v1724_v13 = vsub.f32 %v3604_v61, %v1649_v40 }
 0x3fd   : > { %2639 = vpow2.f32 %v1823_v6  ;;  %v3786_v24 = vpop.eup %2625 }
 0x3fe   : > { %2641 = vpow2.f32 %v1825_v54  ;;  %v1827_v55 = vmul.f32 1.442695, %v1723_v37  ;;  %v1829_v62 = vmul.f32 1.442695, %v1724_v13 }
 0x3ff   : > { %v3788_v0 = vpop.eup %2627 }
 0x400   : > { %v3790_v30 = vpop.eup %2629  ;;  %v1652_v28 = vpop.xlane.xlu0 %1651  ;;  %v2331_v47 = vpack.c.bf16 %v3788_v0, %v3782_v27  ;;  %2643 = vpow2.f32 %v1827_v55 }
 0x401   : > { %v2632_v16 = vpop.eup %2631  ;;  %v1725_v14 = vsub.f32 %v3610_v44, %v1652_v28  ;;  %v1726_v60 = vsub.f32 %v3612_v45, %v1652_v28  ;;  %v2329_v61 = vpack.c.bf16 %v3790_v30, %v3786_v24  ;;  %2645 = vpow2.f32 %v1829_v62  ;;  %v4095_v62 = vld [vmem:[#allocation43_spill] sm:$0xff] }
 0x402   : > { %v2634_v17 = vpop.eup %2633  ;;  %v2319_v7 = vpack.c.bf16 %v2620_v15, %v2632_v16 }
 0x403   : > { %v1831_v33 = vmul.f32 1.442695, %v1725_v14  ;;  %v1833_v41 = vmul.f32 1.442695, %v1726_v60  ;;  %v2317_v42 = vpack.c.bf16 %v2622_v50, %v2634_v17  ;;  %v1655_v51 = vpop.xlane.xlu1 %1654  ;;  %v3798_v32 = vpop.eup %2635  ;;  %v4097_v17 = vld [vmem:[#allocation45_spill] sm:$0xff] }
 0x404   : > { %v1727_v8 = vsub.f32 %v3618_v49, %v1655_v51  ;;  %v1728_v44 = vsub.f32 %v3620_v4, %v1655_v51  ;;  %v3802_v45 = vpop.eup %2637 }
 0x405   : > { %2647 = vpow2.f32 %v1831_v33  ;;  %2318 = vmatprep.subr.bf16.mxu0 %v2317_v42 }
 0x406   : > { %2649 = vpow2.f32 %v1833_v41  ;;  %2320 = vmatpush1.bf16.xpose.msra.mxu0 %v2319_v7  ;;  %v1835_v9 = vmul.f32 1.442695, %v1727_v8  ;;  %v1837_v63 = vmul.f32 1.442695, %v1728_v44 }
 0x407   : > { %v3804_v1 = vpop.eup %2639  ;;  %2322 = vmatprep.subr.bf16.mxu0 %v2321_v25 }
 0x408   : > { %v3809_v20 = vpop.eup %2641  ;;  %v1658_v22 = vpop.xlane.xlu0 %1657  ;;  %v2335_v49 = vpack.c.bf16 %v3804_v1, %v3798_v32  ;;  %2651 = vpow2.f32 %v1835_v9  ;;  %v4098_v9 = vld [vmem:[#allocation12_spill] sm:$0xff]  ;;  %v1880_v32 = vrot.slane %v3723_v35, 5  ;;  %v4105_v1 = vld [vmem:[#allocation18_spill] sm:$0xff] }
 0x409   : > { %v1729_v4 = vsub.f32 %v3626_v52, %v1658_v22  ;;  %v1730_v19 = vsub.f32 %v3628_v53, %v1658_v22  ;;  %v2333_v26 = vpack.c.bf16 %v3809_v20, %v3802_v45  ;;  %2653 = vpow2.f32 %v1837_v63  ;;  %v4099_v63 = vld [vmem:[#allocation46_spill] sm:$0xff] }
 0x40a   : > { %v3817_v57 = vpop.eup %2643 }
 0x40b   : > { %v1839_v59 = vmul.f32 1.442695, %v1729_v4  ;;  %v1841_v34 = vmul.f32 1.442695, %v1730_v19  ;;  %v1661_v43 = vpop.xlane.xlu1 %1660  ;;  %v3821_v48 = vpop.eup %2645  ;;  %v4100_v19 = vld [vmem:[#allocation13_spill] sm:$0xff] }
 0x40c   : > { %v1731_v25 = vsub.f32 %v3634_v5, %v1661_v43  ;;  %v1732_v39 = vsub.f32 %v3636_v10, %v1661_v43 }
 0x40d   : > { %2655 = vpow2.f32 %v1839_v59  ;;  %v4101_v59 = vld [vmem:[#allocation14_spill] sm:$0xff] }
 0x40e   : > { %2657 = vpow2.f32 %v1841_v34  ;;  %2324 = vmatpush1.bf16.xpose.msra.mxu0 %v2323_v21  ;;  %v1843_v53 = vmul.f32 1.442695, %v1731_v25  ;;  %v1845_v6 = vmul.f32 1.442695, %v1732_v39 }
 0x40f   : > { %v3826_v52 = vpop.eup %2647  ;;  %2326 = vmatprep.subr.bf16.mxu0 %v2325_v56 }
 0x410   : > { %v3831_v15 = vpop.eup %2649  ;;  %v1664_v5 = vpop.xlane.xlu0 %1663  ;;  %v2339_v10 = vpack.c.bf16 %v3826_v52, %v3817_v57  ;;  %2659 = vpow2.f32 %v1843_v53 }
 0x411   : > { %v1733_v54 = vsub.f32 %v3642_v2, %v1664_v5  ;;  %v1734_v50 = vsub.f32 %v3644_v23, %v1664_v5  ;;  %v2337_v31 = vpack.c.bf16 %v3831_v15, %v3821_v48  ;;  %2661 = vpow2.f32 %v1845_v6 }
 0x412   : > { %v3839_v36 = vpop.eup %2651 }
 0x413   : > { %v1847_v38 = vmul.f32 1.442695, %v1733_v54  ;;  %v1849_v21 = vmul.f32 1.442695, %v1734_v50  ;;  %v1667_v58 = vpop.xlane.xlu1 %1666  ;;  %v3842_v40 = vpop.eup %2653  ;;  %v4102_v54 = vld [vmem:[#allocation15_spill] sm:$0xff] }
 0x414   : > { %v1735_v56 = vsub.f32 %v3650_v11, %v1667_v58  ;;  %v1736_v37 = vsub.f32 %v3652_v18, %v1667_v58  ;;  %v4094_v11 = vld [vmem:[#allocation42_spill] sm:$0xff]  ;;  %v4096_v18 = vld [vmem:[#allocation44_spill] sm:$0xff]  ;;  %v4104_v58 = vld [vmem:[#allocation17_spill] sm:$0xff] }
 0x415   : > { %2663 = vpow2.f32 %v1847_v38  ;;  %v4103_v38 = vld [vmem:[#allocation16_spill] sm:$0xff] }
 0x416   : > { %2665 = vpow2.f32 %v1849_v21  ;;  %2328 = vmatpush1.bf16.xpose.msra.mxu0 %v2327_v3  ;;  %v1851_v13 = vmul.f32 1.442695, %v1735_v56  ;;  %v1853_v16 = vmul.f32 1.442695, %v1736_v37 }
 0x417   : > { %v3847_v2 = vpop.eup %2655  ;;  %2330 = vmatprep.subr.bf16.mxu0 %v2329_v61 }
 0x418   : > { %v3849_v23 = vpop.eup %2657  ;;  %v1670_v24 = vpop.xlane.xlu0 %1669  ;;  %v2343_v55 = vpack.c.bf16 %v3847_v2, %v3839_v36  ;;  %2667 = vpow2.f32 %v1851_v13  ;;  %v1136_v36 = vlaneseq }
 0x419   : > { %v1737_v30 = vsub.f32 %v4094_v11, %v1670_v24  ;;  %v1738_v28 = vsub.f32 %v4095_v62, %v1670_v24  ;;  %v2341_v46 = vpack.c.bf16 %v3849_v23, %v3842_v40 }
 0x41a   : > { %v3858_v60 = vpop.eup %2659 }
 0x41b   : > { %v1855_v12 = vmul.f32 1.442695, %v1737_v30  ;;  %v1857_v3 = vmul.f32 1.442695, %v1738_v28  ;;  %v1673_v14 = vpop.xlane.xlu1 %1672  ;;  %v3862_v33 = vpop.eup %2661  ;;  %v1883_v30 = vrot.slane %v3726_v29, 5 }
 0x41c   : > { %v1739_v61 = vsub.f32 %v4096_v18, %v1673_v14  ;;  %v1740_v7 = vsub.f32 %v4097_v17, %v1673_v14 }
 0x41d   : > { %2669 = vpow2.f32 %v1855_v12 }
 0x41e   : > { %2671 = vpow2.f32 %v1857_v3  ;;  %2332 = vmatpush1.bf16.xpose.msra.mxu0 %v2331_v47  ;;  %v1859_v42 = vmul.f32 1.442695, %v1739_v61  ;;  %v1861_v8 = vmul.f32 1.442695, %v1740_v7 }
 0x41f   : > { %v3867_v41 = vpop.eup %2663  ;;  %2334 = vmatprep.subr.bf16.mxu0 %v2333_v26  ;;  %2673 = vpow2.f32 %v1853_v16 }
 0x420   : > { %v2666_v51 = vpop.eup %2665  ;;  %v1676_v44 = vpop.xlane.xlu0 %1675  ;;  %v2347_v45 = vpack.c.bf16 %v3867_v41, %v3858_v60  ;;  %2675 = vpow2.f32 %v1859_v42 }
 0x421   : > { %v1741_v20 = vsub.f32 %v4098_v9, %v1676_v44  ;;  %v1742_v22 = vsub.f32 %v4099_v63, %v1676_v44  ;;  %v2345_v4 = vpack.c.bf16 %v2666_v51, %v3862_v33  ;;  %2677 = vpow2.f32 %v1861_v8  ;;  %v2704_v63 = vld [vmem:[%s3067_s22 + $0x8] sm:$0xff] }
 0x422   : > { %v2668_v43 = vpop.eup %2667 }
 0x423   : > { %v1863_v27 = vmul.f32 1.442695, %v1741_v20  ;;  %v1865_v0 = vmul.f32 1.442695, %v1742_v22  ;;  %v1679_v47 = vpop.xlane.xlu1 %1678  ;;  %v1974_v22 = vrot.slane %v2704_v63, 4 }
 0x424   : > { %v1743_v26 = vsub.f32 %v4100_v19, %v1679_v47  ;;  %v1744_v34 = vsub.f32 %v4101_v59, %v1679_v47 }
 0x425   : > { %2679 = vpow2.f32 %v1863_v27 }
 0x426   : > { %2681 = vpow2.f32 %v1865_v0  ;;  %2336 = vmatpush1.bf16.xpose.msra.mxu0 %v2335_v49  ;;  %v1867_v39 = vmul.f32 1.442695, %v1743_v26  ;;  %v1869_v53 = vmul.f32 1.442695, %v1744_v34 }
 0x427   : > { %v2670_v25 = vpop.eup %2669  ;;  %2338 = vmatprep.subr.bf16.mxu0 %v2337_v31  ;;  %v3879_v6 = vpop.permute.xlu1 %245 }
 0x428   : > { %v2672_v48 = vpop.eup %2671  ;;  %v1682_v15 = vpop.xlane.xlu0 %1681  ;;  %v2351_v5 = vpack.c.bf16 %v2670_v25, %v2668_v43  ;;  %v346_v56 = vadd.f32 %v4104_v58, %v3879_v6  ;;  %2683 = vpow2.f32 %v1867_v39  ;;  %v348_v49 = vadd.f32 %v4105_v1, %v3879_v6 }
 0x429   : > { %v1745_v50 = vsub.f32 %v4102_v54, %v1682_v15  ;;  %v1746_v21 = vsub.f32 %v4103_v38, %v1682_v15  ;;  %v2674_v37 = vpop.eup %2673  ;;  %2685 = vpow2.f32 %v1869_v53 }
 0x42a   : > { %v1881_v24 = vrot.slane %v346_v56, 5  ;;  %v2349_v11 = vpack.c.bf16 %v2672_v48, %v2674_v37  ;;  %v1884_v62 = vrot.slane %v348_v49, 5  ;;  %v2676_v28 = vpop.eup %2675 }
 0x42b   : > { %v1871_v31 = vmul.f32 1.442695, %v1745_v50  ;;  %v1873_v13 = vmul.f32 1.442695, %v1746_v21  ;;  %v2678_v3 = vpop.eup %2677 }
 0x42c   : > { %v1882_v12 = vsel %vm1879_vm3, %v1880_v32, %v1881_v24  ;;  %v1885_v35 = vsel %vm1879_vm3, %v1883_v30, %v1884_v62 }
 0x42d   : > { %2687 = vpow2.f32 %v1871_v31  ;;  %1952 = vmatprep.mubr.f32.mxu0 %v1885_v35 }
 0x42e   : > { %2689 = vpow2.f32 %v1873_v13  ;;  %2340 = vmatpush1.bf16.xpose.msra.mxu0 %v2339_v10 }
 0x42f   : > { %v2680_v16 = vpop.eup %2679  ;;  %2342 = vmatprep.subr.bf16.mxu0 %v2341_v46 }
 0x430   : > { %v2682_v14 = vpop.eup %2681  ;;  %v2355_v29 = vpack.c.bf16 %v2680_v16, %v2676_v28 }
 0x431   : > { %v2353_v60 = vpack.c.bf16 %v2682_v14, %v2678_v3 }
 0x432   : > { %v2684_v18 = vpop.eup %2683 }
 0x433   : > { %v2686_v61 = vpop.eup %2685 }
 0x436   : > { %2344 = vmatpush1.bf16.xpose.msra.mxu0 %v2343_v55  ;;  %v1137_v55 = vshrl.u32 %v1136_v36, 7  ;;  %v223_v36 = vld [vmem:[#allocation7 + $0x28] sm:$0x3] }
 0x437   : > { %v2688_v17 = vpop.eup %2687  ;;  %2346 = vmatprep.subr.bf16.mxu0 %v2345_v4 }
 0x438   : > { %v2690_v57 = vpop.eup %2689  ;;  %v2359_v52 = vpack.c.bf16 %v2688_v17, %v2684_v18  ;;  %v1138_v33 = vsub.s32 4, %v1137_v55 }
 0x439   : > { %v2357_v10 = vpack.c.bf16 %v2690_v57, %v2686_v61 }
 0x43e   : > { %2348 = vmatpush1.bf16.xpose.msra.mxu0 %v2347_v45  ;;  %v2703_v45 = vld [vmem:[%s3067_s22] sm:$0xff] }
 0x43f   : > { %2350 = vmatprep.subr.bf16.mxu0 %v2349_v11  ;;  %v1973_v9 = vrot.slane %v2703_v45, 4 }
 0x446   : > { %2352 = vmatpush1.bf16.xpose.msra.mxu0 %v2351_v5 }
 0x447   : > { %2354 = vmatprep.subr.bf16.mxu0 %v2353_v60 }
 0x44e   : > { %2356 = vmatpush1.bf16.xpose.msra.mxu0 %v2355_v29 }
 0x44f   : > { %2358 = vmatprep.subr.bf16.mxu0 %v2357_v10 }
 0x456   : > { %2360 = vmatpush1.bf16.xpose.msra.mxu0 %v2359_v52 }
 0x45d   : > { %1953 = vmatmul.mubr.f32.vlgmr.msra.gmra.mrb[10].mxu0 %v1882_v12 }
 0x497   : > { %v1129_v40 = vpop.f32.mrb[8].mxu0 }
 0x498   : > { %v1131_v23 = vpop.f32.mrb[9].mxu0  ;;  %2691 = vrcp.f32 %v1129_v40 }
 0x499   : > { %2693 = vrcp.f32 %v1131_v23 }
 0x4a2   : > { %v2692_v7 = vpop.eup %2691 }
 0x4a3   : > { %v2694_v41 = vpop.eup %2693  ;;  %v1139_v42 = vrot.slane %v2692_v7, %v1138_v33 }
 0x4a4   : > { %v1143_v51 = vrot.slane %v2694_v41, %v1138_v33 }
 0x4a5   : > { %v1144_v4 = vmul.f32 %v1139_v42, %v1129_v40 }
 0x4a6   : > { %v1145_v27 = vmul.f32 %v1143_v51, %v1131_v23 }
 0x4a7   : > { %v1146_v59 = vadd.f32 %v2703_v45, %v1144_v4 }
 0x4a8   : > { %v1147_v34 = vadd.f32 %v2704_v63, %v1145_v27 }
 0x4a9   : > { %v1148_v53 = vsel %vm511_vm1, %v1146_v59, 0.0 }
 0x4aa   : > { %v1149_v15 = vsel %vm511_vm1, %v1147_v34, 0.0 }
 0x4ab   : > { %v1150_v5 = vadd.f32 %v1149_v15, %v1148_v53 }
 0x530   : > { %v1954_v2 = vpop.f32.mrb[10].mxu0 }
 0x531   : > { %2695 = vrcp.f32 %v1954_v2  ;;  %v1956_v46 = vpop.f32.mrb[11].mxu0 }
 0x532   : > { %2697 = vrcp.f32 %v1956_v46 }
 0x53b   : > { %v2696_v8 = vpop.eup %2695 }
 0x53c   : > { %v2698_v44 = vpop.eup %2697  ;;  %v1964_v20 = vrot.slane %v2696_v8, %v1138_v33 }
 0x53d   : > { %v1968_v0 = vrot.slane %v2698_v44, %v1138_v33 }
 0x53e   : > { %v1969_v47 = vmul.f32 %v1964_v20, %v1954_v2 }
 0x53f   : > { %v1970_v19 = vmul.f32 %v1968_v0, %v1956_v46 }
 0x540   : > { %v1977_v26 = vadd.f32 %v1973_v9, %v1969_v47 }
 0x541   : > { %v1978_v43 = vadd.f32 %v1974_v22, %v1970_v19 }
 0x542   : > { %v1979_v25 = vsel %vm511_vm1, %v1977_v26, 0.0 }
 0x543   : > { %v1980_v39 = vsel %vm511_vm1, %v1978_v43, 0.0 }
 0x544   : > { %v1981_v48 = vadd.f32 %v1980_v39, %v1979_v25  ;;  %v2014_v25 = vrot.slane %v3879_v6, 6 }
 0x546   : > { %1982 = vadd.xlane.f32.xlu0 %v1981_v48 }
 0x54a   : > { %1151 = vadd.xlane.f32.xlu0 %v1150_v5 }
 0x5d3   : > { %v1983_v54 = vpop.xlane.xlu0 %1982 }
 0x5d4   : > { %v1984_v50 = vsel %vm511_vm1, %v1983_v54, 0.0 }
 0x5d5   : > { %v1985_v38 = vrot.slane %v1984_v50, 4 }
 0x5d7   : > { %v1986_v21 = vadd.f32 %v1985_v38, %v1984_v50  ;;  %v1152_v58 = vpop.xlane.xlu0 %1151  ;;  %v1182_v38 = vrot.slane %v3879_v6, 2 }
 0x5d8   : > { %v1153_v56 = vsel %vm511_vm1, %v1152_v58, 0.0 }
 0x5d9   : > { %v1987_v37 = vrot.slane %v1986_v21, 2  ;;  %v1154_v32 = vrot.slane %v1153_v56, 4 }
 0x5db   : > { %v1988_v1 = vadd.f32 %v1987_v37, %v1986_v21  ;;  %v1155_v49 = vadd.f32 %v1154_v32, %v1153_v56 }
 0x5dd   : > { %v1989_v31 = vrot.slane %v1988_v1, 1  ;;  %v1156_v13 = vrot.slane %v1155_v49, 2 }
 0x5df   : > { %v1990_v24 = vadd.f32 %v1989_v31, %v1988_v1  ;;  %v1157_v11 = vadd.f32 %v1156_v13, %v1155_v49 }
 0x5e1   : > { %v1991_v30 = vmul.f32 0.0009765625, %v1990_v24  ;;  %v1158_v62 = vrot.slane %v1157_v11, 1 }
 0x5e3   : > { %v1992_v28 = vsub.f32 %v1977_v26, %v1991_v30  ;;  %v1993_v12 = vsub.f32 %v1978_v43, %v1991_v30  ;;  %v1159_v3 = vadd.f32 %v1158_v62, %v1157_v11  ;;  %v1189_v26 = vpop.permute.xlu1 %1188 }
 0x5e4   : > { %v1190_v1 = vrot.slane %v1189_v26, 2 }
 0x5e5   : > { %v1160_v35 = vmul.f32 0.0009765625, %v1159_v3  ;;  %v1994_v16 = vmul.f32 %v1992_v28, %v1992_v28  ;;  %v1995_v14 = vmul.f32 %v1993_v12, %v1993_v12 }
 0x5e7   : > { %v1161_v29 = vsub.f32 %v1146_v59, %v1160_v35  ;;  %v1162_v60 = vsub.f32 %v1147_v34, %v1160_v35  ;;  %v1996_v18 = vsel %vm511_vm1, %v1994_v16, 0.0  ;;  %v1997_v61 = vsel %vm511_vm1, %v1995_v14, 0.0 }
 0x5e8   : > { %v1998_v17 = vadd.f32 %v1997_v61, %v1996_v18  ;;  %v2015_v34 = vrot.slane %v1189_v26, 6 }
 0x5e9   : > { %v1163_v57 = vmul.f32 %v1161_v29, %v1161_v29  ;;  %v1164_v52 = vmul.f32 %v1162_v60, %v1162_v60 }
 0x5ea   : > { %1999 = vadd.xlane.f32.xlu0 %v1998_v17  ;;  %v2016_v15 = vsel %vm2013_vm4, %v2014_v25, %v2015_v34 }
 0x5eb   : > { %v1165_v10 = vsel %vm511_vm1, %v1163_v57, 0.0  ;;  %v1166_v40 = vsel %vm511_vm1, %v1164_v52, 0.0 }
 0x5ec   : > { %v1167_v23 = vadd.f32 %v1166_v40, %v1165_v10 }
 0x5ee   : > { %1168 = vadd.xlane.f32.xlu0 %v1167_v23 }
 0x604   : > { %2022 = vperm.xlu0 %2433, %v223_v36  }
 0x677   : > { %v2000_v2 = vpop.xlane.xlu0 %1999 }
 0x678   : > { %v2001_v55 = vsel %vm511_vm1, %v2000_v2, 0.0 }
 0x679   : > { %v2002_v46 = vrot.slane %v2001_v55, 4 }
 0x67b   : > { %v2003_v7 = vadd.f32 %v2002_v46, %v2001_v55  ;;  %v1169_v33 = vpop.xlane.xlu0 %1168 }
 0x67c   : > { %v1170_v41 = vsel %vm511_vm1, %v1169_v33, 0.0 }
 0x67d   : > { %v2004_v42 = vrot.slane %v2003_v7, 2  ;;  %v1171_v51 = vrot.slane %v1170_v41, 4 }
 0x67f   : > { %v2005_v8 = vadd.f32 %v2004_v42, %v2003_v7  ;;  %v1172_v44 = vadd.f32 %v1171_v51, %v1170_v41 }
 0x681   : > { %v2006_v45 = vrot.slane %v2005_v8, 1  ;;  %v1173_v9 = vrot.slane %v1172_v44, 2 }
 0x683   : > { %v2007_v20 = vadd.f32 %v2006_v45, %v2005_v8  ;;  %v1174_v63 = vadd.f32 %v1173_v9, %v1172_v44  ;;  %v2023_v59 = vpop.permute.xlu0 %2022 }
 0x684   : > { %v2024_v39 = vrot.slane %v2023_v59, 6 }
 0x685   : > { %v2008_v22 = vmul.f32 0.0009765625, %v2007_v20  ;;  %v1175_v4 = vrot.slane %v1174_v63, 1 }
 0x686   : > { %v2025_v21 = vsel %vm2013_vm4, %v2015_v34, %v2024_v39 }
 0x687   : > { %v2009_v27 = vadd.f32 1e-05, %v2008_v22  ;;  %v1176_v0 = vadd.f32 %v1175_v4, %v1174_v63 }
 0x689   : > { %2699 = vrsqrt.f32 %v2009_v27  ;;  %v1177_v47 = vmul.f32 0.0009765625, %v1176_v0 }
 0x68b   : > { %v1178_v19 = vadd.f32 1e-05, %v1177_v47 }
 0x68d   : > { %2701 = vrsqrt.f32 %v1178_v19 }
 0x693   : > { %v2700_v43 = vpop.eup %2699 }
 0x694   : > { %v2011_v48 = vmul.f32 %v2700_v43, %v1992_v28  ;;  %v2012_v53 = vmul.f32 %v2700_v43, %v1993_v12 }
 0x696   : > { %v2018_v5 = vmul.f32 %v2016_v15, %v2011_v48  ;;  %v2019_v54 = vmul.f32 %v2016_v15, %v2012_v53 }
 0x697   : > { %v2702_v50 = vpop.eup %2701 }
 0x698   : > { %v1180_v58 = vmul.f32 %v2702_v50, %v1161_v29  ;;  %v1181_v56 = vmul.f32 %v2702_v50, %v1162_v60  ;;  %v2027_v37 = vadd.f32 %v2025_v21, %v2018_v5  ;;  %v2028_v32 = vadd.f32 %v2025_v21, %v2019_v54 }
 0x69a   : > { %v1184_v49 = vmul.f32 %v1182_v38, %v1180_v58  ;;  %v1185_v31 = vmul.f32 %v1182_v38, %v1181_v56  ;;  %v2031_v13 = vrot.slane %v2027_v37, 4  ;;  %v2032_v24 = vrot.slane %v2028_v32, 4 }
 0x69c   : > { %2035 = vst [vmem:[%s215_s17] sm:$0xf0] %v2031_v13  ;;  %2036 = vst [vmem:[%s215_s17 + $0x8] sm:$0xf0] %v2032_v24  ;;  %v1192_v11 = vadd.f32 %v1190_v1, %v1184_v49  ;;  %v1193_v6 = vadd.f32 %v1190_v1, %v1185_v31 }
 0x69e   : > { %1194 = vst [vmem:[%s215_s17] sm:$0xf] %v1192_v11  ;;  %1195 = vst [vmem:[%s215_s17 + $0x8] sm:$0xf] %v1193_v6 }
 0x69f   : > { %2804 = shalt.err (!%p2801_p2)
}
 0x6a0   : > { %s2805_s11 = scalar_lea.hbm %s3920_s29, 256  ;;  %s2809_s8 = scalar_lea.hbm %s3967_s3, 512 }
 0x6a1   : > { %p2806_p13 = scmp.ne.s32.totalorder %s3920_s29, %s2805_s11  ;;  %p2810_p4 = scmp.lt.u32.totalorder %s3920_s29, %s3967_s3 }
 0x6a2   : > { %p2811_p5 = scmp.lt.u32.totalorder %s2809_s8, %s2805_s11  ;;  %p2813_p11 = scmp.lt.u32.totalorder %s2805_s11, %s3920_s29 }
 0x6a3   : > { %p2807_p6 = pnand %p2806_p13, %p4106_p0 }
 0x6a4   : > { %p2812_p8 = por %p2811_p5, %p2810_p4 }
 0x6a5   : > { %p2808_p10 = pneg %p2807_p6 }
 0x6a6   : > { %p2814_p1 = por %p2813_p11, %p2812_p8 }
 0x6a8   : > { %p2815_p3 = pnand %p2814_p1, %p2808_p10 }
 0x6aa   : > { %2818 = shalt.err (!%p2815_p3)
}
 0x6ab   : > { %2371 = dma.vmem_to_hbm [thread:$0]  (%p4106_p0), %s3922_s24, 256, %s3920_s29, %s2038_s16  }
 0x6ac PF: > { %s2064_s22 = sand.u32 1, %s2849_s12   ;;  %p4107_p7 = scmp.ne.s32.totalorder %s4012_s19, 0 }
 0x6ad   : > { %p4108_p9 = scmp.ge.s32.totalorder %s2861_s15, 2  ;;  %s2065_s18 = scalar_lea.sflag [#allocation4], %s2064_s22 }
 0x6af   : > { %p2385_p12 = pnand %p4108_p9, %p4107_p7 }
 0x6b1   : > { %2844 = dma.done.wait (!%p2385_p12), %s2065_s18, 256  }
 0x6b2   : > { %2846 = vsyncadd (!%p2385_p12), %s2065_s18, 4294967040  ;;  %p17_p2 = scmp.ge.s32.totalorder %s3002_s4, 4   ;;  %s4109_s12 = smov %s2853_s13 }
 0x6b3   : > { %s4110_s13 = smov %s2857_s14  ;;  %s4111_s14 = smov %s3018_s9 }
 0x6b4   : > { %s4112_s15 = smov %s3002_s4  ;;  %19 = sbr.rel (!%p17_p2) target bundleno = 6 (0x6), region = 85 }
 0x6bb   :  { %2070 = vsyncpa [#allocation3], 1 }
 0x6bc   :  { %2072 = vsyncpa [#allocation3 + $0x1], 1 }
 0x6bd   :  { %2073 = vsyncpa [#allocation6], 1 }
 0x6be   :  { %2074 = vsyncpa [#allocation4], 1 }
 0x6bf   :  { %2076 = vsyncpa [#allocation4 + $0x1], 1 }

</bundles_post_ra>
